<compile_context>
chip_gen: v6e
topology: v6e:2x2x1
jax: 0.10.0
libtpu: 0.0.40
codegen_flags: <defaults>
</compile_context>

<pallas_src>
import jax
import jax.numpy as jnp
from jax.experimental import pallas as pl
from jax.experimental.pallas import tpu as pltpu


# spatial sizes (input + per-conv output) and channel schedule for this config
_S = (16, 14, 12, 10)
_C = (4, 8, 8, 8)
_R = _S[0]                     # per-sample row stride of the batch-stacked layout
_HID = 32
_NOUT = 3
_GEMM_DTYPE = jnp.bfloat16     # MXU operand dtype (accumulation & epilogues stay f32)


# ----------------------------- Pallas kernel ------------------------------- #

def _conv_bn_relu(in_ref, bd_ref, sh_ref, m):
    """Conv2d(k=3,s=1) + folded BatchNorm(eval) + ReLU over the batch-stacked layout.

    in_ref : (rows_in, Win*Cin) f32; sample n valid at rows [16n, 16n+Hin).
    bd_ref : (3, Win*Cin, Wo*Cout) bf16 block-banded weights (kw + BN scale folded).
    sh_ref : (1, Wo*Cout) f32 folded BN shift (conv bias + running stats).
    m      : number of output rows = 16*(N-1) + Ho.
    Returns (m, Wo*Cout) f32; rows [16n, 16n+Ho) are sample n's output, rest is junk
    that is never read by any valid downstream row.
    """
    acc = (
        jnp.dot(in_ref[0:m, :].astype(_GEMM_DTYPE), bd_ref[0],
                preferred_element_type=jnp.float32)
        + jnp.dot(in_ref[1:1 + m, :].astype(_GEMM_DTYPE), bd_ref[1],
                  preferred_element_type=jnp.float32)
        + jnp.dot(in_ref[2:2 + m, :].astype(_GEMM_DTYPE), bd_ref[2],
                  preferred_element_type=jnp.float32)
    )
    return jnp.maximum(acc + sh_ref[...], 0.0)


def _net_kernel(x_ref, bd1, sh1, bd2, sh2, bd3, sh3, w1f, b1, w2,
                o_ref, a1, a2, a3, flat):
    # x_ref: (N*16, 16*4) f32 NHWC input flattened to (N*H, W*C), batch stacked in rows.
    n = o_ref.shape[0]
    m1 = _R * (n - 1) + _S[1]
    m2 = _R * (n - 1) + _S[2]
    m3 = _R * (n - 1) + _S[3]

    # conv stack: 3 block-banded GEMMs per layer for the whole batch at once
    a1[...] = _conv_bn_relu(x_ref, bd1, sh1, m1)      # (m1, 14*8=112)
    a2[...] = _conv_bn_relu(a1, bd2, sh2, m2)         # (m2, 12*8=96)
    a3[...] = _conv_bn_relu(a2, bd3, sh3, m3)         # (m3, 10*8=80)

    # relayout valid rows into a lane-dense (N, 800) flat activation
    hw = _S[3] * _C[3]                                # 80
    for s in range(n):
        for r in range(_S[3]):
            flat[s:s + 1, r * hw:(r + 1) * hw] = a3[_R * s + r:_R * s + r + 1, :]

    # FC1 (800 -> 32) + ReLU as ONE GEMM (flatten permutation folded into w1f)
    h = jnp.maximum(
        jnp.dot(flat[...].astype(_GEMM_DTYPE), w1f[...],
                preferred_element_type=jnp.float32) + b1[...], 0.0)

    # FC2 (32 -> 3, no bias): single store for the whole batch
    o_ref[...] = jnp.dot(h, w2[...],
                         preferred_element_type=jnp.float32).astype(o_ref.dtype)


def net_forward(x_nchw, params):
    n, c, hi, wi = x_nchw.shape
    # NCHW -> NHWC -> (N*H, W*C) batch-stacked layout: the only non-Pallas op (8 KB).
    x2d = jnp.transpose(x_nchw, (0, 2, 3, 1)).reshape(n * hi, wi * c)
    c1, c2, c3 = params["convs"]
    m1 = _R * (n - 1) + _S[1]
    m2 = _R * (n - 1) + _S[2]
    m3 = _R * (n - 1) + _S[3]
    vmem = lambda: pl.BlockSpec(memory_space=pltpu.MemorySpace.VMEM)
    # Grid-less, whole-array resident: total footprint (weights + activations) < 0.5 MiB,
    # far below default scoped VMEM, so no tiling / pipelining / vmem_limit tweaks.
    return pl.pallas_call(
        _net_kernel,
        out_shape=jax.ShapeDtypeStruct((n, _NOUT), jnp.float32),
        in_specs=[vmem() for _ in range(10)],
        out_specs=vmem(),
        scratch_shapes=[
            pltpu.VMEM((m1, _S[1] * _C[1]), jnp.float32),          # a1  (30, 112)
            pltpu.VMEM((m2, _S[2] * _C[2]), jnp.float32),          # a2  (28, 96)
            pltpu.VMEM((m3, _S[3] * _C[3]), jnp.float32),          # a3  (26, 80)
            pltpu.VMEM((n, _S[3] * _S[3] * _C[3]), jnp.float32),   # flat (N, 800)
        ],
    )(x2d, c1["bd"], c1["shift"], c2["bd"], c2["shift"], c3["bd"], c3["shift"],
      params["w1f"], params["b1"], params["w2"])


# ------------------------- parameter construction -------------------------- #

def init_params(key):
    """Deterministic synthetic parameters matching the module's shapes,
    pre-folded / pre-laid-out for the fused kernel (bf16 GEMM operands)."""
    k = 3
    eps = 1e-5
    keys = jax.random.split(key, 32)
    ki = iter(range(32))

    convs = []
    for i in range(3):
        cin, cout = _C[i], _C[i + 1]
        win, wo = _S[i], _S[i + 1]
        # PyTorch Conv2d layout: weight (Cout, Cin, KH, KW); bias (Cout,)
        w = 0.1 * jax.random.normal(keys[next(ki)], (cout, cin, k, k), jnp.float32)
        b = 0.1 * jax.random.normal(keys[next(ki)], (cout,), jnp.float32)
        # BatchNorm2d (eval-mode) parameters
        gamma = 1.0 + 0.1 * jax.random.normal(keys[next(ki)], (cout,), jnp.float32)
        beta = 0.1 * jax.random.normal(keys[next(ki)], (cout,), jnp.float32)
        mean = 0.1 * jax.random.normal(keys[next(ki)], (cout,), jnp.float32)
        var = jax.random.uniform(keys[next(ki)], (cout,), jnp.float32, 0.5, 1.5)

        scale = gamma / jnp.sqrt(var + eps)                      # (cout,)
        shift = (b - mean) * scale + beta                        # (cout,)
        # fold BN scale into the weight; layout (kh, kw, cin, cout)
        w_eff = jnp.transpose(w, (2, 3, 1, 0)) * scale
        # block-banded GEMM weights with kw folded in:
        #   bd[kh, (v+kw)*cin + ci, v*cout + co] = w_eff[kh, kw, ci, co]
        bands = []
        for kh in range(k):
            bk = sum(
                jnp.einsum("uv,ic->uivc",
                           jnp.eye(win, wo, k=-kw, dtype=jnp.float32),
                           w_eff[kh, kw])
                for kw in range(k)
            ).reshape(win * cin, wo * cout)
            bands.append(bk)
        bd = jnp.stack(bands).astype(_GEMM_DTYPE)                # (3, Win*Cin, Wo*Cout)
        shift_tiled = jnp.tile(shift, wo).reshape(1, wo * cout)  # col = v*cout + co (f32)
        convs.append(dict(bd=bd, shift=shift_tiled))

    c_last, s_last = _C[-1], _S[-1]
    flat_in = c_last * s_last * s_last                           # 800
    # PyTorch Linear layouts: w1 (hid, flat_in) over the NCHW flatten; w2 (3, hid)
    w1 = 0.05 * jax.random.normal(keys[next(ki)], (_HID, flat_in), jnp.float32)
    b1 = 0.05 * jax.random.normal(keys[next(ki)], (_HID,), jnp.float32)
    w2 = 0.05 * jax.random.normal(keys[next(ki)], (_NOUT, _HID), jnp.float32)
    # fold the NCHW flatten permutation into w1 so it matches the kernel's lane-dense
    # (h, w, c) flat layout:  w1f[h*80 + w*8 + c, j] = w1[j, c*100 + h*10 + w]
    w1f = jnp.transpose(w1.T.reshape(c_last, s_last, s_last, _HID),
                        (1, 2, 0, 3)).reshape(flat_in, _HID).astype(_GEMM_DTYPE)
    return dict(convs=convs, w1f=w1f, b1=b1.reshape(1, _HID), w2=w2.T)


# --------------------------------- main ------------------------------------ #

if __name__ == "__main__":
    key = jax.random.PRNGKey(0)
    k_x, k_p = jax.random.split(key)
    x = jax.random.normal(k_x, (2, 4, 16, 16), jnp.float32)   # NCHW input
    params = init_params(k_p)

    fwd = jax.jit(lambda xx: net_forward(xx, params))
    out = fwd(x)
    jax.block_until_ready(out)
    assert out.shape == (2, 3), out.shape
    assert out.dtype == jnp.float32
    print("KERNEL_OK")
</pallas_src>

<mosaic_0001>
module attributes {stable_mosaic.version = 11 : i64} {
  func.func @_net_kernel(%arg0: memref<32x64xf32, #tpu.memory_space<vmem>>, %arg1: memref<3x64x112xbf16, #tpu.memory_space<vmem>>, %arg2: memref<1x112xf32, #tpu.memory_space<vmem>>, %arg3: memref<3x112x96xbf16, #tpu.memory_space<vmem>>, %arg4: memref<1x96xf32, #tpu.memory_space<vmem>>, %arg5: memref<3x96x80xbf16, #tpu.memory_space<vmem>>, %arg6: memref<1x80xf32, #tpu.memory_space<vmem>>, %arg7: memref<800x32xbf16, #tpu.memory_space<vmem>>, %arg8: memref<1x32xf32, #tpu.memory_space<vmem>>, %arg9: memref<32x3xf32, #tpu.memory_space<vmem>>, %arg10: memref<2x3xf32, #tpu.memory_space<vmem>>, %arg11: memref<30x112xf32, #tpu.memory_space<vmem>>, %arg12: memref<28x96xf32, #tpu.memory_space<vmem>>, %arg13: memref<26x80xf32, #tpu.memory_space<vmem>>, %arg14: memref<2x800xf32, #tpu.memory_space<vmem>>) attributes {dimension_semantics = [], scalar_prefetch = 0 : i64, scratch_operands = 4 : i64, tpu.core_type = #tpu.core_type<tc>} {
    %c0 = arith.constant 0 : index
    %c0_0 = arith.constant 0 : index
    %0 = vector.load %arg0[%c0, %c0_0] : memref<32x64xf32, #tpu.memory_space<vmem>>, vector<30x64xf32>
    %1 = arith.truncf %0 : vector<30x64xf32> to vector<30x64xbf16>
    %c0_1 = arith.constant 0 : index
    %c0_2 = arith.constant 0 : index
    %c0_3 = arith.constant 0 : index
    %2 = vector.load %arg1[%c0_1, %c0_2, %c0_3] : memref<3x64x112xbf16, #tpu.memory_space<vmem>>, vector<1x64x112xbf16>
    %3 = vector.shape_cast %2 : vector<1x64x112xbf16> to vector<64x112xbf16>
    %cst = arith.constant dense<0.000000e+00> : vector<30x112xf32>
    %4 = tpu.matmul %1, %3, %cst {dimension_numbers = #tpu.dot_dimension_numbers<[1], [0], [0], [1], [0, 0, 1, 1], [], []>} : vector<30x64xbf16>, vector<64x112xbf16>, vector<30x112xf32> -> vector<30x112xf32>
    %c1 = arith.constant 1 : index
    %c0_4 = arith.constant 0 : index
    %5 = vector.load %arg0[%c1, %c0_4] : memref<32x64xf32, #tpu.memory_space<vmem>>, vector<30x64xf32>
    %6 = arith.truncf %5 : vector<30x64xf32> to vector<30x64xbf16>
    %c1_5 = arith.constant 1 : index
    %c0_6 = arith.constant 0 : index
    %c0_7 = arith.constant 0 : index
    %7 = vector.load %arg1[%c1_5, %c0_6, %c0_7] : memref<3x64x112xbf16, #tpu.memory_space<vmem>>, vector<1x64x112xbf16>
    %8 = vector.shape_cast %7 : vector<1x64x112xbf16> to vector<64x112xbf16>
    %cst_8 = arith.constant dense<0.000000e+00> : vector<30x112xf32>
    %9 = tpu.matmul %6, %8, %cst_8 {dimension_numbers = #tpu.dot_dimension_numbers<[1], [0], [0], [1], [0, 0, 1, 1], [], []>} : vector<30x64xbf16>, vector<64x112xbf16>, vector<30x112xf32> -> vector<30x112xf32>
    %10 = arith.addf %4, %9 : vector<30x112xf32>
    %c2 = arith.constant 2 : index
    %c0_9 = arith.constant 0 : index
    %11 = vector.load %arg0[%c2, %c0_9] : memref<32x64xf32, #tpu.memory_space<vmem>>, vector<30x64xf32>
    %12 = arith.truncf %11 : vector<30x64xf32> to vector<30x64xbf16>
    %c2_10 = arith.constant 2 : index
    %c0_11 = arith.constant 0 : index
    %c0_12 = arith.constant 0 : index
    %13 = vector.load %arg1[%c2_10, %c0_11, %c0_12] : memref<3x64x112xbf16, #tpu.memory_space<vmem>>, vector<1x64x112xbf16>
    %14 = vector.shape_cast %13 : vector<1x64x112xbf16> to vector<64x112xbf16>
    %cst_13 = arith.constant dense<0.000000e+00> : vector<30x112xf32>
    %15 = tpu.matmul %12, %14, %cst_13 {dimension_numbers = #tpu.dot_dimension_numbers<[1], [0], [0], [1], [0, 0, 1, 1], [], []>} : vector<30x64xbf16>, vector<64x112xbf16>, vector<30x112xf32> -> vector<30x112xf32>
    %16 = arith.addf %10, %15 : vector<30x112xf32>
    %c0_14 = arith.constant 0 : index
    %c0_15 = arith.constant 0 : index
    %17 = vector.load %arg2[%c0_14, %c0_15] : memref<1x112xf32, #tpu.memory_space<vmem>>, vector<1x112xf32>
    %18 = vector.broadcast %17 : vector<1x112xf32> to vector<30x112xf32>
    %19 = arith.addf %16, %18 : vector<30x112xf32>
    %cst_16 = arith.constant 0.000000e+00 : f32
    %20 = vector.broadcast %cst_16 : f32 to vector<30x112xf32>
    %21 = arith.maximumf %19, %20 : vector<30x112xf32>
    %c0_17 = arith.constant 0 : index
    %c0_18 = arith.constant 0 : index
    %22 = vector.load %arg11[%c0_17, %c0_18] : memref<30x112xf32, #tpu.memory_space<vmem>>, vector<30x112xf32>
    tpu.vector_store %arg11[%c0_17, %c0_18], %21 {strides = array<i32>} : memref<30x112xf32, #tpu.memory_space<vmem>>, vector<30x112xf32>,
    %c0_19 = arith.constant 0 : index
    %c0_20 = arith.constant 0 : index
    %23 = vector.load %arg11[%c0_19, %c0_20] : memref<30x112xf32, #tpu.memory_space<vmem>>, vector<28x112xf32>
    %24 = arith.truncf %23 : vector<28x112xf32> to vector<28x112xbf16>
    %c0_21 = arith.constant 0 : index
    %c0_22 = arith.constant 0 : index
    %c0_23 = arith.constant 0 : index
    %25 = vector.load %arg3[%c0_21, %c0_22, %c0_23] : memref<3x112x96xbf16, #tpu.memory_space<vmem>>, vector<1x112x96xbf16>
    %26 = vector.shape_cast %25 : vector<1x112x96xbf16> to vector<112x96xbf16>
    %cst_24 = arith.constant dense<0.000000e+00> : vector<28x96xf32>
    %27 = tpu.matmul %24, %26, %cst_24 {dimension_numbers = #tpu.dot_dimension_numbers<[1], [0], [0], [1], [0, 0, 1, 1], [], []>} : vector<28x112xbf16>, vector<112x96xbf16>, vector<28x96xf32> -> vector<28x96xf32>
    %c1_25 = arith.constant 1 : index
    %c0_26 = arith.constant 0 : index
    %28 = vector.load %arg11[%c1_25, %c0_26] : memref<30x112xf32, #tpu.memory_space<vmem>>, vector<28x112xf32>
    %29 = arith.truncf %28 : vector<28x112xf32> to vector<28x112xbf16>
    %c1_27 = arith.constant 1 : index
    %c0_28 = arith.constant 0 : index
    %c0_29 = arith.constant 0 : index
    %30 = vector.load %arg3[%c1_27, %c0_28, %c0_29] : memref<3x112x96xbf16, #tpu.memory_space<vmem>>, vector<1x112x96xbf16>
    %31 = vector.shape_cast %30 : vector<1x112x96xbf16> to vector<112x96xbf16>
    %cst_30 = arith.constant dense<0.000000e+00> : vector<28x96xf32>
    %32 = tpu.matmul %29, %31, %cst_30 {dimension_numbers = #tpu.dot_dimension_numbers<[1], [0], [0], [1], [0, 0, 1, 1], [], []>} : vector<28x112xbf16>, vector<112x96xbf16>, vector<28x96xf32> -> vector<28x96xf32>
    %33 = arith.addf %27, %32 : vector<28x96xf32>
    %c2_31 = arith.constant 2 : index
    %c0_32 = arith.constant 0 : index
    %34 = vector.load %arg11[%c2_31, %c0_32] : memref<30x112xf32, #tpu.memory_space<vmem>>, vector<28x112xf32>
    %35 = arith.truncf %34 : vector<28x112xf32> to vector<28x112xbf16>
    %c2_33 = arith.constant 2 : index
    %c0_34 = arith.constant 0 : index
    %c0_35 = arith.constant 0 : index
    %36 = vector.load %arg3[%c2_33, %c0_34, %c0_35] : memref<3x112x96xbf16, #tpu.memory_space<vmem>>, vector<1x112x96xbf16>
    %37 = vector.shape_cast %36 : vector<1x112x96xbf16> to vector<112x96xbf16>
    %cst_36 = arith.constant dense<0.000000e+00> : vector<28x96xf32>
    %38 = tpu.matmul %35, %37, %cst_36 {dimension_numbers = #tpu.dot_dimension_numbers<[1], [0], [0], [1], [0, 0, 1, 1], [], []>} : vector<28x112xbf16>, vector<112x96xbf16>, vector<28x96xf32> -> vector<28x96xf32>
    %39 = arith.addf %33, %38 : vector<28x96xf32>
    %c0_37 = arith.constant 0 : index
    %c0_38 = arith.constant 0 : index
    %40 = vector.load %arg4[%c0_37, %c0_38] : memref<1x96xf32, #tpu.memory_space<vmem>>, vector<1x96xf32>
    %41 = vector.broadcast %40 : vector<1x96xf32> to vector<28x96xf32>
    %42 = arith.addf %39, %41 : vector<28x96xf32>
    %cst_39 = arith.constant 0.000000e+00 : f32
    %43 = vector.broadcast %cst_39 : f32 to vector<28x96xf32>
    %44 = arith.maximumf %42, %43 : vector<28x96xf32>
    %c0_40 = arith.constant 0 : index
    %c0_41 = arith.constant 0 : index
    %45 = vector.load %arg12[%c0_40, %c0_41] : memref<28x96xf32, #tpu.memory_space<vmem>>, vector<28x96xf32>
    tpu.vector_store %arg12[%c0_40, %c0_41], %44 {strides = array<i32>} : memref<28x96xf32, #tpu.memory_space<vmem>>, vector<28x96xf32>,
    %c0_42 = arith.constant 0 : index
    %c0_43 = arith.constant 0 : index
    %46 = vector.load %arg12[%c0_42, %c0_43] : memref<28x96xf32, #tpu.memory_space<vmem>>, vector<26x96xf32>
    %47 = arith.truncf %46 : vector<26x96xf32> to vector<26x96xbf16>
    %c0_44 = arith.constant 0 : index
    %c0_45 = arith.constant 0 : index
    %c0_46 = arith.constant 0 : index
    %48 = vector.load %arg5[%c0_44, %c0_45, %c0_46] : memref<3x96x80xbf16, #tpu.memory_space<vmem>>, vector<1x96x80xbf16>
    %49 = vector.shape_cast %48 : vector<1x96x80xbf16> to vector<96x80xbf16>
    %cst_47 = arith.constant dense<0.000000e+00> : vector<26x80xf32>
    %50 = tpu.matmul %47, %49, %cst_47 {dimension_numbers = #tpu.dot_dimension_numbers<[1], [0], [0], [1], [0, 0, 1, 1], [], []>} : vector<26x96xbf16>, vector<96x80xbf16>, vector<26x80xf32> -> vector<26x80xf32>
    %c1_48 = arith.constant 1 : index
    %c0_49 = arith.constant 0 : index
    %51 = vector.load %arg12[%c1_48, %c0_49] : memref<28x96xf32, #tpu.memory_space<vmem>>, vector<26x96xf32>
    %52 = arith.truncf %51 : vector<26x96xf32> to vector<26x96xbf16>
    %c1_50 = arith.constant 1 : index
    %c0_51 = arith.constant 0 : index
    %c0_52 = arith.constant 0 : index
    %53 = vector.load %arg5[%c1_50, %c0_51, %c0_52] : memref<3x96x80xbf16, #tpu.memory_space<vmem>>, vector<1x96x80xbf16>
    %54 = vector.shape_cast %53 : vector<1x96x80xbf16> to vector<96x80xbf16>
    %cst_53 = arith.constant dense<0.000000e+00> : vector<26x80xf32>
    %55 = tpu.matmul %52, %54, %cst_53 {dimension_numbers = #tpu.dot_dimension_numbers<[1], [0], [0], [1], [0, 0, 1, 1], [], []>} : vector<26x96xbf16>, vector<96x80xbf16>, vector<26x80xf32> -> vector<26x80xf32>
    %56 = arith.addf %50, %55 : vector<26x80xf32>
    %c2_54 = arith.constant 2 : index
    %c0_55 = arith.constant 0 : index
    %57 = vector.load %arg12[%c2_54, %c0_55] : memref<28x96xf32, #tpu.memory_space<vmem>>, vector<26x96xf32>
    %58 = arith.truncf %57 : vector<26x96xf32> to vector<26x96xbf16>
    %c2_56 = arith.constant 2 : index
    %c0_57 = arith.constant 0 : index
    %c0_58 = arith.constant 0 : index
    %59 = vector.load %arg5[%c2_56, %c0_57, %c0_58] : memref<3x96x80xbf16, #tpu.memory_space<vmem>>, vector<1x96x80xbf16>
    %60 = vector.shape_cast %59 : vector<1x96x80xbf16> to vector<96x80xbf16>
    %cst_59 = arith.constant dense<0.000000e+00> : vector<26x80xf32>
    %61 = tpu.matmul %58, %60, %cst_59 {dimension_numbers = #tpu.dot_dimension_numbers<[1], [0], [0], [1], [0, 0, 1, 1], [], []>} : vector<26x96xbf16>, vector<96x80xbf16>, vector<26x80xf32> -> vector<26x80xf32>
    %62 = arith.addf %56, %61 : vector<26x80xf32>
    %c0_60 = arith.constant 0 : index
    %c0_61 = arith.constant 0 : index
    %63 = vector.load %arg6[%c0_60, %c0_61] : memref<1x80xf32, #tpu.memory_space<vmem>>, vector<1x80xf32>
    %64 = vector.broadcast %63 : vector<1x80xf32> to vector<26x80xf32>
    %65 = arith.addf %62, %64 : vector<26x80xf32>
    %cst_62 = arith.constant 0.000000e+00 : f32
    %66 = vector.broadcast %cst_62 : f32 to vector<26x80xf32>
    %67 = arith.maximumf %65, %66 : vector<26x80xf32>
    %c0_63 = arith.constant 0 : index
    %c0_64 = arith.constant 0 : index
    %68 = vector.load %arg13[%c0_63, %c0_64] : memref<26x80xf32, #tpu.memory_space<vmem>>, vector<26x80xf32>
    tpu.vector_store %arg13[%c0_63, %c0_64], %67 {strides = array<i32>} : memref<26x80xf32, #tpu.memory_space<vmem>>, vector<26x80xf32>,
    %c0_65 = arith.constant 0 : index
    %c0_66 = arith.constant 0 : index
    %69 = vector.load %arg13[%c0_65, %c0_66] : memref<26x80xf32, #tpu.memory_space<vmem>>, vector<1x80xf32>
    %c0_67 = arith.constant 0 : index
    %c0_68 = arith.constant 0 : index
    %70 = vector.load %arg14[%c0_67, %c0_68] : memref<2x800xf32, #tpu.memory_space<vmem>>, vector<1x80xf32>
    tpu.vector_store %arg14[%c0_67, %c0_68], %69 {strides = array<i32>} : memref<2x800xf32, #tpu.memory_space<vmem>>, vector<1x80xf32>,
    %c1_69 = arith.constant 1 : index
    %c0_70 = arith.constant 0 : index
    %71 = vector.load %arg13[%c1_69, %c0_70] : memref<26x80xf32, #tpu.memory_space<vmem>>, vector<1x80xf32>
    %c0_71 = arith.constant 0 : index
    %c80 = arith.constant 80 : index
    %72 = vector.load %arg14[%c0_71, %c80] : memref<2x800xf32, #tpu.memory_space<vmem>>, vector<1x80xf32>
    tpu.vector_store %arg14[%c0_71, %c80], %71 {strides = array<i32>} : memref<2x800xf32, #tpu.memory_space<vmem>>, vector<1x80xf32>,
    %c2_72 = arith.constant 2 : index
    %c0_73 = arith.constant 0 : index
    %73 = vector.load %arg13[%c2_72, %c0_73] : memref<26x80xf32, #tpu.memory_space<vmem>>, vector<1x80xf32>
    %c0_74 = arith.constant 0 : index
    %c160 = arith.constant 160 : index
    %74 = vector.load %arg14[%c0_74, %c160] : memref<2x800xf32, #tpu.memory_space<vmem>>, vector<1x80xf32>
    tpu.vector_store %arg14[%c0_74, %c160], %73 {strides = array<i32>} : memref<2x800xf32, #tpu.memory_space<vmem>>, vector<1x80xf32>,
    %c3 = arith.constant 3 : index
    %c0_75 = arith.constant 0 : index
    %75 = vector.load %arg13[%c3, %c0_75] : memref<26x80xf32, #tpu.memory_space<vmem>>, vector<1x80xf32>
    %c0_76 = arith.constant 0 : index
    %c240 = arith.constant 240 : index
    %76 = vector.load %arg14[%c0_76, %c240] : memref<2x800xf32, #tpu.memory_space<vmem>>, vector<1x80xf32>
    tpu.vector_store %arg14[%c0_76, %c240], %75 {strides = array<i32>} : memref<2x800xf32, #tpu.memory_space<vmem>>, vector<1x80xf32>,
    %c4 = arith.constant 4 : index
    %c0_77 = arith.constant 0 : index
    %77 = vector.load %arg13[%c4, %c0_77] : memref<26x80xf32, #tpu.memory_space<vmem>>, vector<1x80xf32>
    %c0_78 = arith.constant 0 : index
    %c320 = arith.constant 320 : index
    %78 = vector.load %arg14[%c0_78, %c320] : memref<2x800xf32, #tpu.memory_space<vmem>>, vector<1x80xf32>
    tpu.vector_store %arg14[%c0_78, %c320], %77 {strides = array<i32>} : memref<2x800xf32, #tpu.memory_space<vmem>>, vector<1x80xf32>,
    %c5 = arith.constant 5 : index
    %c0_79 = arith.constant 0 : index
    %79 = vector.load %arg13[%c5, %c0_79] : memref<26x80xf32, #tpu.memory_space<vmem>>, vector<1x80xf32>
    %c0_80 = arith.constant 0 : index
    %c400 = arith.constant 400 : index
    %80 = vector.load %arg14[%c0_80, %c400] : memref<2x800xf32, #tpu.memory_space<vmem>>, vector<1x80xf32>
    tpu.vector_store %arg14[%c0_80, %c400], %79 {strides = array<i32>} : memref<2x800xf32, #tpu.memory_space<vmem>>, vector<1x80xf32>,
    %c6 = arith.constant 6 : index
    %c0_81 = arith.constant 0 : index
    %81 = vector.load %arg13[%c6, %c0_81] : memref<26x80xf32, #tpu.memory_space<vmem>>, vector<1x80xf32>
    %c0_82 = arith.constant 0 : index
    %c480 = arith.constant 480 : index
    %82 = vector.load %arg14[%c0_82, %c480] : memref<2x800xf32, #tpu.memory_space<vmem>>, vector<1x80xf32>
    tpu.vector_store %arg14[%c0_82, %c480], %81 {strides = array<i32>} : memref<2x800xf32, #tpu.memory_space<vmem>>, vector<1x80xf32>,
    %c7 = arith.constant 7 : index
    %c0_83 = arith.constant 0 : index
    %83 = vector.load %arg13[%c7, %c0_83] : memref<26x80xf32, #tpu.memory_space<vmem>>, vector<1x80xf32>
    %c0_84 = arith.constant 0 : index
    %c560 = arith.constant 560 : index
    %84 = vector.load %arg14[%c0_84, %c560] : memref<2x800xf32, #tpu.memory_space<vmem>>, vector<1x80xf32>
    tpu.vector_store %arg14[%c0_84, %c560], %83 {strides = array<i32>} : memref<2x800xf32, #tpu.memory_space<vmem>>, vector<1x80xf32>,
    %c8 = arith.constant 8 : index
    %c0_85 = arith.constant 0 : index
    %85 = vector.load %arg13[%c8, %c0_85] : memref<26x80xf32, #tpu.memory_space<vmem>>, vector<1x80xf32>
    %c0_86 = arith.constant 0 : index
    %c640 = arith.constant 640 : index
    %86 = vector.load %arg14[%c0_86, %c640] : memref<2x800xf32, #tpu.memory_space<vmem>>, vector<1x80xf32>
    tpu.vector_store %arg14[%c0_86, %c640], %85 {strides = array<i32>} : memref<2x800xf32, #tpu.memory_space<vmem>>, vector<1x80xf32>,
    %c9 = arith.constant 9 : index
    %c0_87 = arith.constant 0 : index
    %87 = vector.load %arg13[%c9, %c0_87] : memref<26x80xf32, #tpu.memory_space<vmem>>, vector<1x80xf32>
    %c0_88 = arith.constant 0 : index
    %c720 = arith.constant 720 : index
    %88 = vector.load %arg14[%c0_88, %c720] : memref<2x800xf32, #tpu.memory_space<vmem>>, vector<1x80xf32>
    tpu.vector_store %arg14[%c0_88, %c720], %87 {strides = array<i32>} : memref<2x800xf32, #tpu.memory_space<vmem>>, vector<1x80xf32>,
    %c16 = arith.constant 16 : index
    %c0_89 = arith.constant 0 : index
    %89 = vector.load %arg13[%c16, %c0_89] : memref<26x80xf32, #tpu.memory_space<vmem>>, vector<1x80xf32>
    %c1_90 = arith.constant 1 : index
    %c0_91 = arith.constant 0 : index
    %90 = vector.load %arg14[%c1_90, %c0_91] : memref<2x800xf32, #tpu.memory_space<vmem>>, vector<1x80xf32>
    tpu.vector_store %arg14[%c1_90, %c0_91], %89 {strides = array<i32>} : memref<2x800xf32, #tpu.memory_space<vmem>>, vector<1x80xf32>,
    %c17 = arith.constant 17 : index
    %c0_92 = arith.constant 0 : index
    %91 = vector.load %arg13[%c17, %c0_92] : memref<26x80xf32, #tpu.memory_space<vmem>>, vector<1x80xf32>
    %c1_93 = arith.constant 1 : index
    %c80_94 = arith.constant 80 : index
    %92 = vector.load %arg14[%c1_93, %c80_94] : memref<2x800xf32, #tpu.memory_space<vmem>>, vector<1x80xf32>
    tpu.vector_store %arg14[%c1_93, %c80_94], %91 {strides = array<i32>} : memref<2x800xf32, #tpu.memory_space<vmem>>, vector<1x80xf32>,
    %c18 = arith.constant 18 : index
    %c0_95 = arith.constant 0 : index
    %93 = vector.load %arg13[%c18, %c0_95] : memref<26x80xf32, #tpu.memory_space<vmem>>, vector<1x80xf32>
    %c1_96 = arith.constant 1 : index
    %c160_97 = arith.constant 160 : index
    %94 = vector.load %arg14[%c1_96, %c160_97] : memref<2x800xf32, #tpu.memory_space<vmem>>, vector<1x80xf32>
    tpu.vector_store %arg14[%c1_96, %c160_97], %93 {strides = array<i32>} : memref<2x800xf32, #tpu.memory_space<vmem>>, vector<1x80xf32>,
    %c19 = arith.constant 19 : index
    %c0_98 = arith.constant 0 : index
    %95 = vector.load %arg13[%c19, %c0_98] : memref<26x80xf32, #tpu.memory_space<vmem>>, vector<1x80xf32>
    %c1_99 = arith.constant 1 : index
    %c240_100 = arith.constant 240 : index
    %96 = vector.load %arg14[%c1_99, %c240_100] : memref<2x800xf32, #tpu.memory_space<vmem>>, vector<1x80xf32>
    tpu.vector_store %arg14[%c1_99, %c240_100], %95 {strides = array<i32>} : memref<2x800xf32, #tpu.memory_space<vmem>>, vector<1x80xf32>,
    %c20 = arith.constant 20 : index
    %c0_101 = arith.constant 0 : index
    %97 = vector.load %arg13[%c20, %c0_101] : memref<26x80xf32, #tpu.memory_space<vmem>>, vector<1x80xf32>
    %c1_102 = arith.constant 1 : index
    %c320_103 = arith.constant 320 : index
    %98 = vector.load %arg14[%c1_102, %c320_103] : memref<2x800xf32, #tpu.memory_space<vmem>>, vector<1x80xf32>
    tpu.vector_store %arg14[%c1_102, %c320_103], %97 {strides = array<i32>} : memref<2x800xf32, #tpu.memory_space<vmem>>, vector<1x80xf32>,
    %c21 = arith.constant 21 : index
    %c0_104 = arith.constant 0 : index
    %99 = vector.load %arg13[%c21, %c0_104] : memref<26x80xf32, #tpu.memory_space<vmem>>, vector<1x80xf32>
    %c1_105 = arith.constant 1 : index
    %c400_106 = arith.constant 400 : index
    %100 = vector.load %arg14[%c1_105, %c400_106] : memref<2x800xf32, #tpu.memory_space<vmem>>, vector<1x80xf32>
    tpu.vector_store %arg14[%c1_105, %c400_106], %99 {strides = array<i32>} : memref<2x800xf32, #tpu.memory_space<vmem>>, vector<1x80xf32>,
    %c22 = arith.constant 22 : index
    %c0_107 = arith.constant 0 : index
    %101 = vector.load %arg13[%c22, %c0_107] : memref<26x80xf32, #tpu.memory_space<vmem>>, vector<1x80xf32>
    %c1_108 = arith.constant 1 : index
    %c480_109 = arith.constant 480 : index
    %102 = vector.load %arg14[%c1_108, %c480_109] : memref<2x800xf32, #tpu.memory_space<vmem>>, vector<1x80xf32>
    tpu.vector_store %arg14[%c1_108, %c480_109], %101 {strides = array<i32>} : memref<2x800xf32, #tpu.memory_space<vmem>>, vector<1x80xf32>,
    %c23 = arith.constant 23 : index
    %c0_110 = arith.constant 0 : index
    %103 = vector.load %arg13[%c23, %c0_110] : memref<26x80xf32, #tpu.memory_space<vmem>>, vector<1x80xf32>
    %c1_111 = arith.constant 1 : index
    %c560_112 = arith.constant 560 : index
    %104 = vector.load %arg14[%c1_111, %c560_112] : memref<2x800xf32, #tpu.memory_space<vmem>>, vector<1x80xf32>
    tpu.vector_store %arg14[%c1_111, %c560_112], %103 {strides = array<i32>} : memref<2x800xf32, #tpu.memory_space<vmem>>, vector<1x80xf32>,
    %c24 = arith.constant 24 : index
    %c0_113 = arith.constant 0 : index
    %105 = vector.load %arg13[%c24, %c0_113] : memref<26x80xf32, #tpu.memory_space<vmem>>, vector<1x80xf32>
    %c1_114 = arith.constant 1 : index
    %c640_115 = arith.constant 640 : index
    %106 = vector.load %arg14[%c1_114, %c640_115] : memref<2x800xf32, #tpu.memory_space<vmem>>, vector<1x80xf32>
    tpu.vector_store %arg14[%c1_114, %c640_115], %105 {strides = array<i32>} : memref<2x800xf32, #tpu.memory_space<vmem>>, vector<1x80xf32>,
    %c25 = arith.constant 25 : index
    %c0_116 = arith.constant 0 : index
    %107 = vector.load %arg13[%c25, %c0_116] : memref<26x80xf32, #tpu.memory_space<vmem>>, vector<1x80xf32>
    %c1_117 = arith.constant 1 : index
    %c720_118 = arith.constant 720 : index
    %108 = vector.load %arg14[%c1_117, %c720_118] : memref<2x800xf32, #tpu.memory_space<vmem>>, vector<1x80xf32>
    tpu.vector_store %arg14[%c1_117, %c720_118], %107 {strides = array<i32>} : memref<2x800xf32, #tpu.memory_space<vmem>>, vector<1x80xf32>,
    %c0_119 = arith.constant 0 : index
    %c0_120 = arith.constant 0 : index
    %109 = vector.load %arg14[%c0_119, %c0_120] : memref<2x800xf32, #tpu.memory_space<vmem>>, vector<2x800xf32>
    %110 = arith.truncf %109 : vector<2x800xf32> to vector<2x800xbf16>
    %c0_121 = arith.constant 0 : index
    %c0_122 = arith.constant 0 : index
    %111 = vector.load %arg7[%c0_121, %c0_122] : memref<800x32xbf16, #tpu.memory_space<vmem>>, vector<800x32xbf16>
    %cst_123 = arith.constant dense<0.000000e+00> : vector<2x32xf32>
    %112 = tpu.matmul %110, %111, %cst_123 {dimension_numbers = #tpu.dot_dimension_numbers<[1], [0], [0], [1], [0, 0, 1, 1], [], []>} : vector<2x800xbf16>, vector<800x32xbf16>, vector<2x32xf32> -> vector<2x32xf32>
    %c0_124 = arith.constant 0 : index
    %c0_125 = arith.constant 0 : index
    %113 = vector.load %arg8[%c0_124, %c0_125] : memref<1x32xf32, #tpu.memory_space<vmem>>, vector<1x32xf32>
    %114 = vector.broadcast %113 : vector<1x32xf32> to vector<2x32xf32>
    %115 = arith.addf %112, %114 : vector<2x32xf32>
    %cst_126 = arith.constant 0.000000e+00 : f32
    %116 = vector.broadcast %cst_126 : f32 to vector<2x32xf32>
    %117 = arith.maximumf %115, %116 : vector<2x32xf32>
    %c0_127 = arith.constant 0 : index
    %c0_128 = arith.constant 0 : index
    %118 = vector.load %arg9[%c0_127, %c0_128] : memref<32x3xf32, #tpu.memory_space<vmem>>, vector<32x3xf32>
    %cst_129 = arith.constant dense<0.000000e+00> : vector<2x3xf32>
    %119 = tpu.matmul %117, %118, %cst_129 {dimension_numbers = #tpu.dot_dimension_numbers<[1], [0], [0], [1], [0, 0, 1, 1], [], []>} : vector<2x32xf32>, vector<32x3xf32>, vector<2x3xf32> -> vector<2x3xf32>
    %c0_130 = arith.constant 0 : index
    %c0_131 = arith.constant 0 : index
    %120 = vector.load %arg10[%c0_130, %c0_131] : memref<2x3xf32, #tpu.memory_space<vmem>>, vector<2x3xf32>
    tpu.vector_store %arg10[%c0_130, %c0_131], %119 {strides = array<i32>} : memref<2x3xf32, #tpu.memory_space<vmem>>, vector<2x3xf32>,
    return
  }
}

</mosaic_0001>

<bundles_post_ra>
// kernel: _lambda_.1
= control target key start
LH: loop header
LB: loop body
LE: loop exit
PB: predicated region body
PF: predicated region fallthrough
CT: control target
= control target key end

     0   :  { %15 = vsyncpa [#allocation7], 0  ;;  %s3189_s0 = inlined_call_operand.vmem [shape: f32[32,64], index: 0, kind: input, shape index: {}]   ;;  %s3190_s1 = inlined_call_operand.hbm [shape: bf16[3,64,112], index: 1, kind: input, shape index: {}]   ;;  %s3191_s2 = inlined_call_operand.vmem [shape: f32[1,112], index: 2, kind: input, shape index: {}]   ;;  %s3192_s3 = inlined_call_operand.hbm [shape: bf16[3,112,96], index: 3, kind: input, shape index: {}]   ;;  %s3193_s4 = inlined_call_operand.vmem [shape: f32[1,96], index: 4, kind: input, shape index: {}]   ;;  %s3194_s5 = inlined_call_operand.vmem [shape: bf16[3,96,80], index: 5, kind: input, shape index: {}]   ;;  %s3195_s6 = inlined_call_operand.vmem [shape: f32[1,80], index: 6, kind: input, shape index: {}]   ;;  %s3196_s7 = inlined_call_operand.vmem [shape: bf16[800,32], index: 7, kind: input, shape index: {}]   ;;  %s3197_s8 = inlined_call_operand.vmem [shape: f32[1,32], index: 8, kind: input, shape index: {}]   ;;  %s3198_s9 = inlined_call_operand.hbm [shape: f32[32,3], index: 9, kind: input, shape index: {}]   ;;  %s3199_s10 = inlined_call_operand.hbm [shape: f32[2,3], index: 10, kind: output, shape index: {}]  }
   0x1   :  { %16 = vsyncpa [#allocation10], 0 }
   0x2   :  { %17 = vsyncpa [#allocation8], 0  ;;  %s2758_s13 = smov [#allocation9]   ;;  %s2759_s15 = smov [#allocation6]  }
   0x3   :  { %s39_s14 = sshll.u32 %s2758_s13, 4  ;;  %s25_s16 = sshll.u32 %s2759_s15, 4  ;;  %s40_s14 = int_to_ptr.vmem [resolvable:$true] %s39_s14  ;;  %s26_s16 = int_to_ptr.vmem [resolvable:$true] %s25_s16 }
   0x4   :  { %s2680_s17 = scalar_lea.vmem %s40_s14, 2688  ;;  %p2685_p1 = scmp.lt.s32.totalorder %s40_s14, %s40_s14 }
   0x5   :  { %p2681_p0 = scmp.ne.s32.totalorder %s40_s14, %s2680_s17  ;;  %p2686_p2 = scmp.lt.s32.totalorder %s2680_s17, %s2680_s17 }
   0x7   :  { %p2687_p3 = por %p2686_p2, %p2685_p1 }
   0x9   :  { %p2688_p4 = pnand %p2687_p3, %p2681_p0 }
   0xb   :  { %2691 = shalt.err (!%p2688_p4)
}
   0xc   :  { %s2760_s18 = smov 64   ;;  %s2761_s19 = smov 4  }
   0xd   :  { %45 = dma.hbm_to_vmem [thread:$0]  %s3192_s3, 2688, %s40_s14, [#allocation10], %s2760_s18, %s2760_s18, %s2761_s19  }
   0xe   :  { %s2700_s22 = scalar_lea.vmem %s26_s16, 1536  ;;  %p2705_p6 = scmp.lt.s32.totalorder %s26_s16, %s26_s16 }
   0xf   :  { %p2701_p5 = scmp.ne.s32.totalorder %s26_s16, %s2700_s22  ;;  %p2706_p7 = scmp.lt.s32.totalorder %s2700_s22, %s2700_s22 }
  0x11   :  { %p2707_p8 = por %p2706_p7, %p2705_p6 }
  0x13   :  { %p2708_p9 = pnand %p2707_p8, %p2701_p5 }
  0x15   :  { %2711 = shalt.err (!%p2708_p9)
}
  0x16   :  { %31 = dma.hbm_to_vmem [thread:$0]  %s3190_s1, 1536, %s26_s16, [#allocation7], %s2760_s18, %s2760_s18, %s2761_s19  }
  0x17   :  { %s2762_s25 = smov [#allocation11]  }
  0x18   :  { %s61_s26 = sshll.u32 %s2762_s25, 4  ;;  %s62_s26 = int_to_ptr.vmem [resolvable:$true] %s61_s26 }
  0x19   :  { %s2720_s27 = scalar_lea.vmem %s62_s26, 512  ;;  %p2725_p11 = scmp.lt.s32.totalorder %s62_s26, %s62_s26 }
  0x1a   :  { %p2721_p10 = scmp.ne.s32.totalorder %s62_s26, %s2720_s27  ;;  %p2726_p12 = scmp.lt.s32.totalorder %s2720_s27, %s2720_s27 }
  0x1c   :  { %p2727_p13 = por %p2726_p12, %p2725_p11 }
  0x1e   :  { %p2728_p0 = pnand %p2727_p13, %p2721_p10 }
  0x20   :  { %2731 = shalt.err (!%p2728_p0)
}
  0x21   :  { %s2763_s3 = smov 128   ;;  %s2764_s28 = smov 8  }
  0x22   :  { %67 = dma.hbm_to_vmem [thread:$0]  %s3198_s9, 512, %s62_s26, [#allocation10], %s2763_s3, %s2763_s3, %s2764_s28  }
  0x23   :  { %2752 = dma.done.wait [#allocation7], 1536  }
  0x24   :  { %2753 = vsyncadd [#allocation7], 4294965760 }
  0x25   :  { %2754 = dma.done.wait [#allocation10], 3200  }
  0x26   :  { %2755 = vsyncadd [#allocation10], 4294964096  ;;  %v2569_v0 = vld [vmem:[#allocation6 + $0x38] sm:$0xff]   ;;  %v2571_v2 = vld [vmem:[#allocation6 + $0x30] sm:$0xff]   ;;  %vm131_vm0 = vcmask 523264   ;;  %vm379_vm1 = vcmask 916480  }
  0x27   :  { %v2570_v1 = vld [vmem:[#allocation6 + $0x18] sm:$0xff]   ;;  %2395 = vmatprep.subr.bf16.mxu0 %v2569_v0  ;;  %v2572_v3 = vld [vmem:[#allocation6 + $0x10] sm:$0xff]   ;;  %v2573_v4 = vld [vmem:[#allocation6 + $0x28] sm:$0xff]   ;;  %vm383_vm2 = vcmask 914432   ;;  %vm757_vm3 = vcmask 785408   ;;  %vm761_vm4 = vcmask 781312  }
  0x28   :  { %2407 = vmatprep.subr.bf16.mxu1 %v2570_v1  ;;  %2396 = vmatpush3.bf16.msra.mxu0 %v2569_v0  ;;  %v2574_v5 = vld [vmem:[#allocation6 + $0x8] sm:$0xff]   ;;  %v2575_v6 = vld [vmem:[#allocation6 + $0x20] sm:$0xff]   ;;  %v92_v7 = vld [vmem:[%s3189_s0 + $0x1] sm:$0xff]  ;;  %vm1111_vm5 = vcmask 654336   ;;  %vm1115_vm6 = vcmask 648192   ;;  %vm1118_vm7 = vcmask 647168  }
  0x29   :  { %2408 = vmatpush3.bf16.msra.mxu1 %v2570_v1  ;;  %2397 = vmatprep.subr.bf16.mxu0 %v2571_v2  ;;  %v93_v8 = vld [vmem:[%s3189_s0 + $0x9] sm:$0xff]  ;;  %v78_v9 = vld [vmem:[%s3189_s0] sm:$0xff]  ;;  %v94_v13 = vld [vmem:[%s3189_s0 + $0x11] sm:$0xff]  ;;  %s2765_s15 = smov 112   ;;  %s2766_s19 = smov 80   ;;  %vm1134_vm8 = vcmask 1041024  }
  0x2a   :  { %2409 = vmatprep.subr.bf16.mxu1 %v2572_v3  ;;  %v2576_v10 = vld [vmem:[#allocation6] sm:$0xff]   ;;  %v96_v11 = vpack.c.bf16 %v93_v8, %v92_v7  ;;  %v95_v15 = vld [vmem:[%s3189_s0 + $0x19] sm:$0x3f]  ;;  %v2577_v18 = vld [vmem:[#allocation6 + $0x58] sm:$0xff]   ;;  %s2769_s9 = smov 16   ;;  %s2770_s17 = smov 48  }
  0x2b   :  { %v79_v12 = vld [vmem:[%s3189_s0 + $0x8] sm:$0xff]  ;;  %v80_v16 = vld [vmem:[%s3189_s0 + $0x10] sm:$0xff]  ;;  %v81_v17 = vld [vmem:[%s3189_s0 + $0x18] sm:$0x3f]  ;;  %v97_v19 = vpack.c.bf16 %v95_v15, %v94_v13  ;;  %vm1135_vm9 = vcmask 256002   ;;  %vm1166_vm11 = vcmask 1041280  }
  0x2c   :  { %2398 = vmatpush3.bf16.msra.mxu0 %v2571_v2  ;;  %v82_v14 = vpack.c.bf16 %v79_v12, %v78_v9  ;;  %2403 = vmatprep.mubr.msk.bf16.mxu0 %vm131_vm0, %v96_v11  ;;  %v266_v20 = vld [vmem:[%s3189_s0 + $0x2] sm:$0xff]  ;;  %v83_v21 = vpack.c.bf16 %v81_v17, %v80_v16  ;;  %v267_v23 = vld [vmem:[%s3189_s0 + $0xa] sm:$0xff]  ;;  %v2579_v25 = vld [vmem:[#allocation6 + $0x48] sm:$0xff]   ;;  %vm1167_vm12 = vcmask 518146   ;;  %vm1184_vm13 = vcmask 1040896  }
  0x2d   :  { %2410 = vmatpush3.bf16.msra.mxu1 %v2572_v3  ;;  %2399 = vmatprep.subr.bf16.mxu0 %v2573_v4  ;;  %v2578_v22 = vld [vmem:[#allocation6 + $0x50] sm:$0xff]   ;;  %v270_v24 = vpack.c.bf16 %v267_v23, %v266_v20  ;;  %v2580_v26 = vld [vmem:[#allocation6 + $0x40] sm:$0xff]   ;;  %v2581_v30 = vld [vmem:[#allocation9 + $0x68] sm:$0xff]   ;;  %vm1185_vm14 = vcmask 124930   ;;  %vm1150_vm15 = vcmask 909568  }
  0x2e   :  { %2411 = vmatprep.subr.bf16.mxu1 %v2574_v5  ;;  %2415 = vmatprep.mubr.msk.bf16.mxu1 %vm131_vm0, %v82_v14  ;;  %v268_v27 = vld [vmem:[%s3189_s0 + $0x12] sm:$0xff]  ;;  %v269_v28 = vld [vmem:[%s3189_s0 + $0x1a] sm:$0x3f]  ;;  %v2585_v34 = vld [vmem:[#allocation9 + $0x58] sm:$0xff]   ;;  %s2767_s0 = smov 32  }
  0x2f   :  { %v271_v29 = vpack.c.bf16 %v269_v28, %v268_v27  ;;  %v2582_v31 = vld [vmem:[#allocation9 + $0x30] sm:$0xff]   ;;  %v2583_v32 = vld [vmem:[#allocation9 + $0x60] sm:$0xff]   ;;  %v2584_v33 = vld [vmem:[#allocation9 + $0x28] sm:$0xff]  }
  0x30   :  { %2400 = vmatpush3.bf16.msra.mxu0 %v2573_v4  ;;  %v2586_v35 = vld [vmem:[#allocation9 + $0x20] sm:$0xff]   ;;  %v2587_v36 = vld [vmem:[#allocation9 + $0x50] sm:$0xff]   ;;  %v2588_v37 = vld [vmem:[#allocation9 + $0x18] sm:$0xff]  }
  0x31   :  { %2412 = vmatpush3.bf16.msra.mxu1 %v2574_v5  ;;  %2401 = vmatprep.subr.bf16.mxu0 %v2575_v6  ;;  %v2589_v38 = vld [vmem:[#allocation9 + $0x48] sm:$0xff]   ;;  %v2590_v39 = vld [vmem:[#allocation9 + $0x10] sm:$0xff]   ;;  %v2591_v40 = vld [vmem:[#allocation9 + $0x40] sm:$0xff]  }
  0x32   :  { %2413 = vmatprep.subr.bf16.mxu1 %v2576_v10  ;;  %v2592_v41 = vld [vmem:[#allocation9 + $0x8] sm:$0xff]   ;;  %v2593_v42 = vld [vmem:[#allocation9 + $0x38] sm:$0xff]   ;;  %v2594_v43 = vld [vmem:[#allocation9] sm:$0xff]  }
  0x33   :  { %v2595_v44 = vld [vmem:[#allocation9 + $0xa0] sm:$0xff]   ;;  %v2105_v54 = vld [vmem:[%s3191_s2] ss:$0 sm:$0xff]  ;;  %v2598_v27 = vld [vmem:[#allocation9 + $0x88] sm:$0xff]  }
  0x34   :  { %2402 = vmatpush3.bf16.msra.mxu0 %v2575_v6  ;;  %v2599_v28 = vld [vmem:[#allocation9 + $0x80] sm:$0xff]   ;;  %vm3081_vm10 = vmor %vm1135_vm9, %vm1134_vm8  ;;  %vm1200_vm8 = vcmask 778368  }
  0x35   :  { %2414 = vmatpush3.bf16.msra.mxu1 %v2576_v10  ;;  %2419 = vmatprep.subr.bf16.mxu0 %v2577_v18 }
  0x36   :  { %2431 = vmatprep.subr.bf16.mxu1 %v2581_v30 }
  0x37   :  { %2404 = vmatmul.mubr.msk.bf16.vlgmr.msra.gmra.mxu0 %vm131_vm0, %v97_v19 }
  0x38   :  { %2416 = vmatmul.mubr.msk.bf16.vlgmr.msra.gmra.mxu1 %vm131_vm0, %v83_v21  ;;  %2420 = vmatpush3.bf16.msra.mxu0 %v2577_v18 }
  0x39   :  { %2421 = vmatprep.subr.bf16.mxu0 %v2578_v22  ;;  %2427 = vmatprep.mubr.msk.bf16.mxu0 %vm131_vm0, %v270_v24  ;;  %v2596_v24 = vld [vmem:[#allocation9 + $0x98] sm:$0xff]  }
  0x3a   :  { %2432 = vmatpush3.bf16.msra.mxu1 %v2581_v30  ;;  %v2601_v30 = vld [vmem:[#allocation9 + $0x70] sm:$0xff]  }
  0x3b   :  { %2433 = vmatprep.subr.bf16.mxu1 %v2583_v32 }
  0x3c   :  { %2422 = vmatpush3.bf16.msra.mxu0 %v2578_v22 }
  0x3d   :  { %2423 = vmatprep.subr.bf16.mxu0 %v2579_v25 }
  0x3e   :  { %2434 = vmatpush3.bf16.msra.mxu1 %v2583_v32 }
  0x3f   :  { %2435 = vmatprep.subr.bf16.mxu1 %v2585_v34 }
  0x40   :  { %2424 = vmatpush3.bf16.msra.mxu0 %v2579_v25 }
  0x41   :  { %2425 = vmatprep.subr.bf16.mxu0 %v2580_v26 }
  0x42   :  { %2436 = vmatpush3.bf16.msra.mxu1 %v2585_v34  ;;  %v2602_v34 = vld [vmem:[%s3194_s5 + $0x58] sm:$0xff]  }
  0x43   :  { %2437 = vmatprep.subr.bf16.mxu1 %v2587_v36 }
  0x44   :  { %2426 = vmatpush3.bf16.msra.mxu0 %v2580_v26  ;;  %v2597_v26 = vld [vmem:[#allocation9 + $0x90] sm:$0xff]  }
  0x45   :  { %2449 = vmatprep.subr.bf16.mxu0 %v2582_v31 }
  0x46   :  { %2438 = vmatpush3.bf16.msra.mxu1 %v2587_v36  ;;  %v2604_v36 = vld [vmem:[%s3194_s5 + $0x50] sm:$0xff]  }
  0x47   :  { %2428 = vmatmul.mubr.msk.bf16.vlgmr.msra.gmra.mxu0 %vm131_vm0, %v271_v29  ;;  %2439 = vmatprep.subr.bf16.mxu1 %v2589_v38  ;;  %v2600_v29 = vld [vmem:[#allocation9 + $0x78] sm:$0xff]  }
  0x48   :  { %2450 = vmatpush3.bf16.msra.mxu0 %v2582_v31 }
  0x49   :  { %2451 = vmatprep.subr.bf16.mxu0 %v2584_v33 }
  0x4a   :  { %2440 = vmatpush3.bf16.msra.mxu1 %v2589_v38  ;;  %v2606_v38 = vld [vmem:[%s3194_s5 + $0x48] sm:$0xff]  }
  0x4b   :  { %2441 = vmatprep.subr.bf16.mxu1 %v2591_v40 }
  0x4c   :  { %2452 = vmatpush3.bf16.msra.mxu0 %v2584_v33 }
  0x4d   :  { %2453 = vmatprep.subr.bf16.mxu0 %v2586_v35 }
  0x4e   :  { %2442 = vmatpush3.bf16.msra.mxu1 %v2591_v40  ;;  %v2608_v40 = vld [vmem:[%s3194_s5 + $0x40] sm:$0xff]  }
  0x4f   :  { %2443 = vmatprep.subr.bf16.mxu1 %v2593_v42 }
  0x50   :  { %2454 = vmatpush3.bf16.msra.mxu0 %v2586_v35  ;;  %v2603_v35 = vld [vmem:[%s3194_s5 + $0x28] sm:$0xff]  }
  0x51   :  { %2455 = vmatprep.subr.bf16.mxu0 %v2588_v37 }
  0x52   :  { %2444 = vmatpush3.bf16.msra.mxu1 %v2593_v42  ;;  %v2610_v42 = vld [vmem:[%s3194_s5 + $0x38] sm:$0xff]  }
  0x53   :  { %2467 = vmatprep.subr.bf16.mxu1 %v2595_v44 }
  0x54   :  { %2456 = vmatpush3.bf16.msra.mxu0 %v2588_v37  ;;  %v2605_v37 = vld [vmem:[%s3194_s5 + $0x20] sm:$0xff]  }
  0x55   :  { %2457 = vmatprep.subr.bf16.mxu0 %v2590_v39 }
  0x58   :  { %2458 = vmatpush3.bf16.msra.mxu0 %v2590_v39  ;;  %v2607_v39 = vld [vmem:[%s3194_s5 + $0x18] sm:$0xff]  }
  0x59   :  { %2459 = vmatprep.subr.bf16.mxu0 %v2592_v41 }
  0x5c   :  { %2460 = vmatpush3.bf16.msra.mxu0 %v2592_v41  ;;  %v2609_v41 = vld [vmem:[%s3194_s5 + $0x10] sm:$0xff]  }
  0x5d   :  { %2461 = vmatprep.subr.bf16.mxu0 %v2594_v43 }
  0x60   :  { %2462 = vmatpush3.bf16.msra.mxu0 %v2594_v43  ;;  %v2611_v43 = vld [vmem:[%s3194_s5 + $0x8] sm:$0xff]  }
  0x61   :  { %2485 = vmatprep.subr.bf16.mxu0 %v2602_v34 }
  0xf7   :  { %v2405_v45 = vpop.f32.mrf.mxu0 }
  0xf8   :  { %v2417_v46 = vpop.f32.mrf.mxu1 }
  0xf9   :  { %v172_v47 = vpop.f32.mrf.mxu0  ;;  %v260_v52 = vadd.f32 %v2417_v46, %v2405_v45  ;;  %v2613_v45 = vld [vmem:[%s3194_s5] sm:$0xff]   ;;  %v2614_v46 = vld [vmem:[%s3194_s5 + $0x88] sm:$0xff]  }
  0xfa   :  { %v251_v48 = vpop.f32.mrf.mxu1 }
  0xfb   :  { %v2406_v49 = vpop.f32.mrf.mxu0  ;;  %v252_v55 = vadd.f32 %v251_v48, %v172_v47 }
  0xfc   :  { %v2418_v50 = vpop.f32.mrf.mxu1 }
  0xfd   :  { %v175_v51 = vpop.f32.mrf.mxu0  ;;  %v263_v59 = vadd.f32 %v2418_v50, %v2406_v49 }
  0xfe   :  { %v254_v57 = vpop.f32.mrf.mxu1 }
  0xff   :  { %v255_v63 = vadd.f32 %v254_v57, %v175_v51 }
 0x107   :  { %v2429_v53 = vpop.f32.mrf.mxu0 }
 0x108   :  { %v362_v56 = vadd.f32 %v2429_v53, %v260_v52 }
 0x109   :  { %v345_v58 = vpop.f32.mrf.mxu0 }
 0x10a   :  { %v373_v60 = vadd.f32 %v2105_v54, %v362_v56  ;;  %v360_v61 = vadd.f32 %v345_v58, %v252_v55  ;;  %v2133_v56 = vld [vmem:[%s3193_s4] ss:$0 sm:$0xff] }
 0x10b   :  { %v2430_v62 = vpop.f32.mrf.mxu0 }
 0x10c   :  { %v377_v0 = vmax.f32 %v373_v60, 0.0  ;;  %v371_v1 = vadd.f32 %v2105_v54, %v360_v61  ;;  %v363_v2 = vadd.f32 %v2430_v62, %v263_v59 }
 0x10d   :  { %v348_v3 = vpop.f32.mrf.mxu0 }
 0x10e   :  { %382 = vst.msk [vmem:[#allocation2 + $0x10] sm:$0xff] %vm379_vm1, %v377_v0  ;;  %v375_v4 = vmax.f32 %v371_v1, 0.0  ;;  %v374_v5 = vadd.f32 %v2105_v54, %v363_v2  ;;  %v361_v6 = vadd.f32 %v348_v3, %v255_v63 }
 0x110   :  { %380 = vst.msk [vmem:[#allocation2] sm:$0xff] %vm379_vm1, %v375_v4  ;;  %v378_v7 = vmax.f32 %v374_v5, 0.0  ;;  %v372_v8 = vadd.f32 %v2105_v54, %v361_v6 }
 0x112   :  { %384 = vst.msk [vmem:[#allocation2 + $0x18] sm:$0x3f] %vm383_vm2, %v378_v7  ;;  %v376_v9 = vmax.f32 %v372_v8, 0.0  ;;  %vm3088_vm2 = vmor %vm1167_vm12, %vm1166_vm11 }
 0x114   :  { %381 = vst.msk [vmem:[#allocation2 + $0x8] sm:$0xff] %vm379_vm1, %v376_v9 }
 0x115   :  { %v387_v19 = vld [vmem:[#allocation2 + $0x10] sm:$0xff] }
 0x117   :  { %v385_v10 = vld [vmem:[#allocation2] sm:$0xff] }
 0x119   :  { %v407_v11 = vld [vmem:[#allocation2 + $0x11] sm:$0xff]  ;;  %v408_v12 = vld [vmem:[#allocation2 + $0x19] sm:$0xf] }
 0x11a   :  { %v388_v13 = vld [vmem:[#allocation2 + $0x18] sm:$0xf]  ;;  %v410_v22 = vpack.c.bf16 %v408_v12, %v407_v11 }
 0x11b   :  { %v405_v14 = vld [vmem:[#allocation2 + $0x1] sm:$0xff]  ;;  %v406_v15 = vld [vmem:[#allocation2 + $0x9] sm:$0xff]  ;;  %v390_v23 = vpack.c.bf16 %v388_v13, %v387_v19  ;;  %v622_v31 = vld [vmem:[#allocation2 + $0x12] sm:$0xff] }
 0x11c   :  { %v386_v16 = vld [vmem:[#allocation2 + $0x8] sm:$0xff]  ;;  %v409_v17 = vpack.c.bf16 %v406_v15, %v405_v14  ;;  %v623_v32 = vld [vmem:[#allocation2 + $0x1a] sm:$0xf] }
 0x11d   :  { %v389_v18 = vpack.c.bf16 %v386_v16, %v385_v10  ;;  %v620_v20 = vld [vmem:[#allocation2 + $0x2] sm:$0xff]  ;;  %v621_v21 = vld [vmem:[#allocation2 + $0xa] sm:$0xff]  ;;  %v625_v33 = vpack.c.bf16 %v623_v32, %v622_v31 }
 0x11e   :  { %2445 = vmatprep.mubr.msk.bf16.mxu1 %vm379_vm1, %v409_v17  ;;  %v624_v25 = vpack.c.bf16 %v621_v21, %v620_v20  ;;  %v2619_v31 = vld [vmem:[%s3194_s5 + $0x60] sm:$0xff]  }
 0x11f   :  { %2463 = vmatprep.mubr.msk.bf16.mxu0 %vm379_vm1, %v389_v18  ;;  %2446 = vmatmul.mubr.msk.bf16.vlgmr.msra.gmra.mxu1 %vm379_vm1, %v410_v22 }
 0x120   :  { %2464 = vmatmul.mubr.msk.bf16.vlgmr.msra.gmra.mxu0 %vm379_vm1, %v390_v23  ;;  %2468 = vmatpush3.bf16.msra.mxu1 %v2595_v44  ;;  %v2612_v44 = vld [vmem:[%s3194_s5 + $0x30] sm:$0xff]  }
 0x121   :  { %2481 = vmatprep.mubr.msk.bf16.mxu1 %vm379_vm1, %v624_v25  ;;  %2469 = vmatprep.subr.bf16.mxu1 %v2596_v24 }
 0x122   :  { %2486 = vmatpush3.bf16.msra.mxu0 %v2602_v34 }
 0x123   :  { %2487 = vmatprep.subr.bf16.mxu0 %v2604_v36 }
 0x124   :  { %2470 = vmatpush3.bf16.msra.mxu1 %v2596_v24 }
 0x125   :  { %2471 = vmatprep.subr.bf16.mxu1 %v2597_v26 }
 0x126   :  { %2488 = vmatpush3.bf16.msra.mxu0 %v2604_v36 }
 0x127   :  { %2489 = vmatprep.subr.bf16.mxu0 %v2606_v38 }
 0x128   :  { %2472 = vmatpush3.bf16.msra.mxu1 %v2597_v26  ;;  %v2615_v26 = vld [vmem:[%s3194_s5 + $0x80] sm:$0xff]  }
 0x129   :  { %2473 = vmatprep.subr.bf16.mxu1 %v2598_v27 }
 0x12a   :  { %2490 = vmatpush3.bf16.msra.mxu0 %v2606_v38 }
 0x12b   :  { %2491 = vmatprep.subr.bf16.mxu0 %v2608_v40 }
 0x12c   :  { %2474 = vmatpush3.bf16.msra.mxu1 %v2598_v27 }
 0x12d   :  { %2475 = vmatprep.subr.bf16.mxu1 %v2599_v28 }
 0x12e   :  { %2492 = vmatpush3.bf16.msra.mxu0 %v2608_v40 }
 0x12f   :  { %2493 = vmatprep.subr.bf16.mxu0 %v2610_v42 }
 0x130   :  { %2476 = vmatpush3.bf16.msra.mxu1 %v2599_v28  ;;  %v2616_v28 = vld [vmem:[%s3194_s5 + $0x78] sm:$0xff]  }
 0x131   :  { %2477 = vmatprep.subr.bf16.mxu1 %v2600_v29 }
 0x132   :  { %2494 = vmatpush3.bf16.msra.mxu0 %v2610_v42 }
 0x133   :  { %2495 = vmatprep.subr.bf16.mxu0 %v2612_v44 }
 0x134   :  { %2478 = vmatpush3.bf16.msra.mxu1 %v2600_v29  ;;  %v2617_v29 = vld [vmem:[%s3194_s5 + $0x70] sm:$0xff]  }
 0x135   :  { %2479 = vmatprep.subr.bf16.mxu1 %v2601_v30 }
 0x136   :  { %2496 = vmatpush3.bf16.msra.mxu0 %v2612_v44  ;;  %v2182_v44 = vld [vmem:[%s3195_s6] ss:$0 sm:$0xff] }
 0x137   :  { %2517 = vmatprep.subr.bf16.mxu0 %v2614_v46 }
 0x138   :  { %2480 = vmatpush3.bf16.msra.mxu1 %v2601_v30  ;;  %v2618_v30 = vld [vmem:[%s3194_s5 + $0x68] sm:$0xff]  }
 0x139   :  { %2501 = vmatprep.subr.bf16.mxu1 %v2603_v35 }
 0x13b   :  { %2482 = vmatmul.mubr.msk.bf16.vlgmr.msra.gmra.mxu1 %vm379_vm1, %v625_v33 }
 0x13c   :  { %2502 = vmatpush3.bf16.msra.mxu1 %v2603_v35 }
 0x13d   :  { %2503 = vmatprep.subr.bf16.mxu1 %v2605_v37 }
 0x140   :  { %2504 = vmatpush3.bf16.msra.mxu1 %v2605_v37 }
 0x141   :  { %2505 = vmatprep.subr.bf16.mxu1 %v2607_v39 }
 0x144   :  { %2506 = vmatpush3.bf16.msra.mxu1 %v2607_v39 }
 0x145   :  { %2507 = vmatprep.subr.bf16.mxu1 %v2609_v41 }
 0x148   :  { %2508 = vmatpush3.bf16.msra.mxu1 %v2609_v41 }
 0x149   :  { %2509 = vmatprep.subr.bf16.mxu1 %v2611_v43 }
 0x14c   :  { %2510 = vmatpush3.bf16.msra.mxu1 %v2611_v43 }
 0x14d   :  { %2511 = vmatprep.subr.bf16.mxu1 %v2613_v45 }
 0x150   :  { %2512 = vmatpush3.bf16.msra.mxu1 %v2613_v45 }
 0x1df   :  { %v2447_v47 = vpop.f32.mrf.mxu1 }
 0x1e0   :  { %v2465_v48 = vpop.f32.mrf.mxu0 }
 0x1e1   :  { %v508_v49 = vpop.f32.mrf.mxu1  ;;  %v614_v54 = vadd.f32 %v2465_v48, %v2447_v47 }
 0x1e2   :  { %v605_v50 = vpop.f32.mrf.mxu0 }
 0x1e3   :  { %v2448_v51 = vpop.f32.mrf.mxu1  ;;  %v606_v57 = vadd.f32 %v605_v50, %v508_v49 }
 0x1e4   :  { %v2466_v52 = vpop.f32.mrf.mxu0 }
 0x1e5   :  { %v511_v53 = vpop.f32.mrf.mxu1  ;;  %v617_v61 = vadd.f32 %v2466_v52, %v2448_v51 }
 0x1e6   :  { %v608_v59 = vpop.f32.mrf.mxu0 }
 0x1e7   :  { %v609_v1 = vadd.f32 %v608_v59, %v511_v53 }
 0x1fb   :  { %v2483_v55 = vpop.f32.mrf.mxu1 }
 0x1fc   :  { %v740_v58 = vadd.f32 %v2483_v55, %v614_v54 }
 0x1fd   :  { %v723_v60 = vpop.f32.mrf.mxu1 }
 0x1fe   :  { %v751_v62 = vadd.f32 %v2133_v56, %v740_v58  ;;  %v738_v63 = vadd.f32 %v723_v60, %v606_v57  ;;  %v2620_v58 = vld [vmem:[%s3196_s7 + $0x78] sm:$0xff]  }
 0x1ff   :  { %v2484_v0 = vpop.f32.mrf.mxu1  ;;  %2321 = vmatprep.subr.bf16.mxu1 %v2620_v58 }
 0x200   :  { %v755_v2 = vmax.f32 %v751_v62, 0.0  ;;  %v749_v3 = vadd.f32 %v2133_v56, %v738_v63  ;;  %v741_v4 = vadd.f32 %v2484_v0, %v617_v61  ;;  %v2621_v0 = vld [vmem:[%s3196_s7 + $0x38] sm:$0xff]  }
 0x201   :  { %v726_v5 = vpop.f32.mrf.mxu1 }
 0x202   :  { %760 = vst.msk [vmem:[#allocation3 + $0x10] sm:$0xff] %vm757_vm3, %v755_v2  ;;  %v753_v6 = vmax.f32 %v749_v3, 0.0  ;;  %v752_v7 = vadd.f32 %v2133_v56, %v741_v4  ;;  %v739_v8 = vadd.f32 %v726_v5, %v609_v1  ;;  %v2622_v1 = vld [vmem:[%s3196_s7 + $0xf8] sm:$0xff]   ;;  %v2623_v2 = vld [vmem:[%s3196_s7 + $0x70] sm:$0xff]  }
 0x203   :  { %v2624_v4 = vld [vmem:[%s3196_s7 + $0xb8] sm:$0xff]   ;;  %v2625_v5 = vld [vmem:[%s3196_s7 + $0x30] sm:$0xff]  }
 0x204   :  { %758 = vst.msk [vmem:[#allocation3] sm:$0xff] %vm757_vm3, %v753_v6  ;;  %v756_v9 = vmax.f32 %v752_v7, 0.0  ;;  %v750_v10 = vadd.f32 %v2133_v56, %v739_v8  ;;  %v2626_v6 = vld [vmem:[%s3196_s7 + $0xf0] sm:$0xff]   ;;  %v2627_v7 = vld [vmem:[%s3196_s7 + $0x68] sm:$0xff]  }
 0x206   :  { %762 = vst.msk [vmem:[#allocation3 + $0x18] sm:$0xf] %vm761_vm4, %v756_v9  ;;  %v754_v11 = vmax.f32 %v750_v10, 0.0  ;;  %vm3093_vm4 = vmor %vm1185_vm14, %vm1184_vm13 }
 0x208   :  { %759 = vst.msk [vmem:[#allocation3 + $0x8] sm:$0xff] %vm757_vm3, %v754_v11  ;;  %v2628_v11 = vld [vmem:[%s3196_s7 + $0xb0] sm:$0xff]  }
 0x209   :  { %v765_v21 = vld [vmem:[#allocation3 + $0x10] sm:$0xff] }
 0x20b   :  { %v763_v12 = vld [vmem:[#allocation3] sm:$0xff] }
 0x20d   :  { %v783_v13 = vld [vmem:[#allocation3 + $0x11] sm:$0xff]  ;;  %v784_v14 = vld [vmem:[#allocation3 + $0x19] sm:$0x3] }
 0x20e   :  { %v766_v15 = vld [vmem:[#allocation3 + $0x18] sm:$0x3]  ;;  %v786_v24 = vpack.c.bf16 %v784_v14, %v783_v13  ;;  %v985_v33 = vld [vmem:[#allocation3 + $0x1a] sm:$0x3]  ;;  %v2629_v13 = vld [vmem:[%s3196_s7 + $0x28] sm:$0xff]  }
 0x20f   :  { %v781_v16 = vld [vmem:[#allocation3 + $0x1] sm:$0xff]  ;;  %v782_v17 = vld [vmem:[#allocation3 + $0x9] sm:$0xff]  ;;  %v768_v25 = vpack.c.bf16 %v766_v15, %v765_v21  ;;  %v984_v32 = vld [vmem:[#allocation3 + $0x12] sm:$0xff] }
 0x210   :  { %v764_v18 = vld [vmem:[#allocation3 + $0x8] sm:$0xff]  ;;  %v785_v19 = vpack.c.bf16 %v782_v17, %v781_v16  ;;  %v987_v34 = vpack.c.bf16 %v985_v33, %v984_v32  ;;  %v2631_v16 = vld [vmem:[%s3196_s7 + $0x60] sm:$0xff]  }
 0x211   :  { %v767_v20 = vpack.c.bf16 %v764_v18, %v763_v12  ;;  %v982_v22 = vld [vmem:[#allocation3 + $0x2] sm:$0xff]  ;;  %v983_v23 = vld [vmem:[#allocation3 + $0xa] sm:$0xff] }
 0x212   :  { %2497 = vmatprep.mubr.msk.bf16.mxu0 %vm757_vm3, %v785_v19  ;;  %v986_v27 = vpack.c.bf16 %v983_v23, %v982_v22  ;;  %v2630_v14 = vld [vmem:[%s3196_s7 + $0xe8] sm:$0xff]   ;;  %v2633_v21 = vld [vmem:[%s3196_s7 + $0x20] sm:$0xff]  }
 0x213   :  { %2513 = vmatprep.mubr.msk.bf16.mxu1 %vm757_vm3, %v767_v20  ;;  %2498 = vmatmul.mubr.msk.bf16.vlgmr.msra.gmra.mxu0 %vm757_vm3, %v786_v24  ;;  %v2632_v17 = vld [vmem:[%s3196_s7 + $0xa8] sm:$0xff]   ;;  %v2634_v22 = vld [vmem:[%s3196_s7 + $0xe0] sm:$0xff]   ;;  %v2635_v24 = vld [vmem:[%s3196_s7 + $0x58] sm:$0xff]  }
 0x214   :  { %2514 = vmatmul.mubr.msk.bf16.vlgmr.msra.gmra.mxu1 %vm757_vm3, %v768_v25  ;;  %2518 = vmatpush3.bf16.msra.mxu0 %v2614_v46  ;;  %v2636_v25 = vld [vmem:[%s3196_s7 + $0xa0] sm:$0xff]  }
 0x215   :  { %2529 = vmatprep.mubr.msk.bf16.mxu0 %vm757_vm3, %v986_v27  ;;  %2519 = vmatprep.subr.bf16.mxu0 %v2615_v26  ;;  %v2637_v27 = vld [vmem:[%s3196_s7 + $0x18] sm:$0xff]  }
 0x216   :  { %2322 = vmatpush3.bf16.msra.mxu1 %v2621_v0  ;;  %v2666_v0 = vld [vmem:[%s3196_s7 + $0x150] sm:$0xff]  }
 0x217   :  { %2323 = vmatprep.subr.bf16.mxu1 %v2623_v2 }
 0x218   :  { %2520 = vmatpush3.bf16.msra.mxu0 %v2615_v26 }
 0x219   :  { %2521 = vmatprep.subr.bf16.mxu0 %v2616_v28 }
 0x21a   :  { %2324 = vmatpush3.bf16.msra.mxu1 %v2625_v5 }
 0x21b   :  { %2325 = vmatprep.subr.bf16.mxu1 %v2627_v7 }
 0x21c   :  { %2522 = vmatpush3.bf16.msra.mxu0 %v2616_v28  ;;  %v2638_v28 = vld [vmem:[%s3196_s7 + $0xd8] sm:$0xff]  }
 0x21d   :  { %2523 = vmatprep.subr.bf16.mxu0 %v2617_v29 }
 0x21e   :  { %2326 = vmatpush3.bf16.msra.mxu1 %v2629_v13 }
 0x21f   :  { %2327 = vmatprep.subr.bf16.mxu1 %v2631_v16 }
 0x220   :  { %2524 = vmatpush3.bf16.msra.mxu0 %v2617_v29  ;;  %v2639_v29 = vld [vmem:[%s3196_s7 + $0x50] sm:$0xff]  }
 0x221   :  { %2525 = vmatprep.subr.bf16.mxu0 %v2618_v30 }
 0x222   :  { %2328 = vmatpush3.bf16.msra.mxu1 %v2633_v21 }
 0x223   :  { %2329 = vmatprep.subr.bf16.mxu1 %v2635_v24 }
 0x224   :  { %2526 = vmatpush3.bf16.msra.mxu0 %v2618_v30 }
 0x225   :  { %2527 = vmatprep.subr.bf16.mxu0 %v2619_v31 }
 0x226   :  { %2330 = vmatpush3.bf16.msra.mxu1 %v2637_v27 }
 0x227   :  { %2331 = vmatprep.subr.bf16.mxu1 %v2639_v29 }
 0x228   :  { %2528 = vmatpush3.bf16.msra.mxu0 %v2619_v31  ;;  %v2640_v31 = vld [vmem:[%s3196_s7 + $0x98] sm:$0xff]  }
 0x229   :  { %2343 = vmatprep.subr.bf16.mxu0 %v2622_v1 }
 0x22b   :  { %2530 = vmatmul.mubr.msk.bf16.vlgmr.msra.gmra.mxu0 %vm757_vm3, %v987_v34  ;;  %v2641_v34 = vld [vmem:[%s3196_s7 + $0x10] sm:$0xff]  }
 0x22c   :  { %2344 = vmatpush3.bf16.msra.mxu0 %v2624_v4  ;;  %2332 = vmatpush3.bf16.msra.mxu1 %v2641_v34 }
 0x22d   :  { %2345 = vmatprep.subr.bf16.mxu0 %v2626_v6 }
 0x230   :  { %2346 = vmatpush3.bf16.msra.mxu0 %v2628_v11 }
 0x231   :  { %2347 = vmatprep.subr.bf16.mxu0 %v2630_v14 }
 0x234   :  { %2348 = vmatpush3.bf16.msra.mxu0 %v2632_v17  ;;  %v2772_v17 = vmov 1983009808  }
 0x235   :  { %2349 = vmatprep.subr.bf16.mxu0 %v2634_v22 }
 0x238   :  { %2350 = vmatpush3.bf16.msra.mxu0 %v2636_v25 }
 0x239   :  { %2351 = vmatprep.subr.bf16.mxu0 %v2638_v28 }
 0x23c   :  { %2352 = vmatpush3.bf16.msra.mxu0 %v2640_v31 }
 0x2d3   :  { %v2499_v35 = vpop.f32.mrf.mxu0 }
 0x2d4   :  { %v2515_v36 = vpop.f32.mrf.mxu1 }
 0x2d5   :  { %v876_v37 = vpop.f32.mrf.mxu0  ;;  %v976_v42 = vadd.f32 %v2515_v36, %v2499_v35  ;;  %v2642_v35 = vld [vmem:[%s3196_s7 + $0xd0] sm:$0xff]   ;;  %v2643_v36 = vld [vmem:[%s3196_s7 + $0x48] sm:$0xff]  }
 0x2d6   :  { %v967_v38 = vpop.f32.mrf.mxu1  ;;  %2353 = vmatprep.subr.bf16.mxu0 %v2642_v35  ;;  %2333 = vmatprep.subr.bf16.mxu1 %v2643_v36 }
 0x2d7   :  { %v2500_v39 = vpop.f32.mrf.mxu0  ;;  %v968_v45 = vadd.f32 %v967_v38, %v876_v37  ;;  %v2644_v38 = vld [vmem:[%s3196_s7 + $0x90] sm:$0xff]  }
 0x2d8   :  { %v2516_v40 = vpop.f32.mrf.mxu1  ;;  %2354 = vmatpush3.bf16.msra.mxu0 %v2644_v38 }
 0x2d9   :  { %v879_v41 = vpop.f32.mrf.mxu0  ;;  %v979_v49 = vadd.f32 %v2516_v40, %v2500_v39  ;;  %v2645_v39 = vld [vmem:[%s3196_s7 + $0x8] sm:$0xff]  }
 0x2da   :  { %v970_v47 = vpop.f32.mrf.mxu1  ;;  %v2646_v40 = vld [vmem:[%s3196_s7 + $0xc8] sm:$0xff]   ;;  %2334 = vmatpush3.bf16.msra.mxu1 %v2645_v39 }
 0x2db   :  { %v971_v53 = vadd.f32 %v970_v47, %v879_v41  ;;  %v2647_v41 = vld [vmem:[%s3196_s7 + $0x40] sm:$0xff]   ;;  %2355 = vmatprep.subr.bf16.mxu0 %v2646_v40 }
 0x2dc   :  { %2335 = vmatprep.subr.bf16.mxu1 %v2647_v41  ;;  %v2653_v41 = vld [vmem:[%s3196_s7 + $0x138] sm:$0xff]  }
 0x2eb   :  { %v2531_v43 = vpop.f32.mrf.mxu0 }
 0x2ec   :  { %v1094_v46 = vadd.f32 %v2531_v43, %v976_v42  ;;  %v2648_v43 = vld [vmem:[%s3196_s7 + $0x88] sm:$0xff]  }
 0x2ed   :  { %v1077_v48 = vpop.f32.mrf.mxu0  ;;  %2356 = vmatpush3.bf16.msra.mxu0 %v2648_v43 }
 0x2ee   :  { %v1105_v50 = vadd.f32 %v2182_v44, %v1094_v46  ;;  %v1092_v51 = vadd.f32 %v1077_v48, %v968_v45  ;;  %v2650_v45 = vld [vmem:[%s3196_s7 + $0xc0] sm:$0xff]  }
 0x2ef   :  { %v2532_v52 = vpop.f32.mrf.mxu0  ;;  %v2649_v46 = vld [vmem:[%s3196_s7] sm:$0xff]   ;;  %2357 = vmatprep.subr.bf16.mxu0 %v2650_v45 }
 0x2f0   :  { %v1109_v54 = vmax.f32 %v1105_v50, 0.0  ;;  %v1103_v55 = vadd.f32 %v2182_v44, %v1092_v51  ;;  %v1095_v56 = vadd.f32 %v2532_v52, %v979_v49  ;;  %v2651_v48 = vld [vmem:[%s3196_s7 + $0x80] sm:$0xff]   ;;  %v2652_v49 = vld [vmem:[%s3196_s7 + $0x178] sm:$0xff]   ;;  %2336 = vmatpush3.bf16.msra.mxu1 %v2649_v46  ;;  %v2656_v46 = vld [vmem:[%s3196_s7 + $0x188] sm:$0xff]  }
 0x2f1   :  { %v1080_v57 = vpop.f32.mrf.mxu0  ;;  %2365 = vmatprep.subr.bf16.mxu1 %v2652_v49  ;;  %2358 = vmatpush3.bf16.msra.mxu0 %v2651_v48 }
 0x2f2   :  { %1114 = vst.msk [vmem:[#allocation4 + $0x10] sm:$0xff] %vm1111_vm5, %v1109_v54  ;;  %v1107_v59 = vmax.f32 %v1103_v55, 0.0  ;;  %v1106_v60 = vadd.f32 %v2182_v44, %v1095_v56  ;;  %v1093_v61 = vadd.f32 %v1080_v57, %v971_v53  ;;  %v2771_v53 = vmov 0.0  }
 0x2f3   :  { %2533 = vmatprep.subr.bf16.mxu0 %v2771_v53 }
 0x2f4   :  { %1112 = vst.msk [vmem:[#allocation4] sm:$0xff] %vm1111_vm5, %v1107_v59  ;;  %v1110_v62 = vmax.f32 %v1106_v60, 0.0  ;;  %v1104_v63 = vadd.f32 %v2182_v44, %v1093_v61 }
 0x2f6   :  { %1116 = vst.msk [vmem:[#allocation4 + $0x18] sm:$0x3] %vm1115_vm6, %v1110_v62  ;;  %v1108_v3 = vmax.f32 %v1104_v63, 0.0  ;;  %vm1216_vm6 = vcmask 1041152  }
 0x2f8   :  { %1113 = vst.msk [vmem:[#allocation4 + $0x8] sm:$0xff] %vm1111_vm5, %v1108_v3  ;;  %v2669_v3 = vld [vmem:[%s3196_s7 + $0x108] sm:$0xff]  }
 0x2f9   :  { %v2193_v8 = vld.sshfl [vmem:[#allocation4 + $0x13] sm:$0x1 pattern:$0x76325410]  ;;  %v1251_v9 = vld [vmem:[#allocation4 + $0x10] sm:$0x1] }
 0x2fa   :  { %1290 = vrot.lane.b32.xlu1 %v2193_v8, %s2765_s15  ;;  %v2191_v10 = vld.sshfl [vmem:[#allocation4 + $0x11] sm:$0x1 pattern:$0x76325410]  ;;  %1252 = vst.msk [vmem:[#allocation5 + $0x1] sm:$0x1] %vm1118_vm7, %v1251_v9 }
 0x2fb   :  { %1262 = vrot.lane.b32.xlu0 %v2191_v10, %s2766_s19  ;;  %v1117_v12 = vld [vmem:[#allocation4] sm:$0x1]  ;;  %v2194_v15 = vld.sshfl [vmem:[#allocation4 + $0x14] sm:$0x1 pattern:$0x76325410] }
 0x2fc   :  { %1119 = vst.msk [vmem:[#allocation5] sm:$0x1] %vm1118_vm7, %v1117_v12  ;;  %v2183_v18 = vld.sshfl [vmem:[#allocation4 + $0x1] sm:$0x1 pattern:$0x76325410] }
 0x2fd   :  { %v1352_v19 = vld [vmem:[#allocation4 + $0x18] sm:$0x1]  ;;  %v2192_v23 = vld.sshfl [vmem:[#allocation4 + $0x12] sm:$0x1 pattern:$0x76325410] }
 0x2fe   :  { %1305 = vrot.lane.b32.xlu1 %v2194_v15, %s2760_s18  ;;  %1353 = vst.msk [vmem:[#allocation5 + $0xb] sm:$0x1] %vm1118_vm7, %v1352_v19  ;;  %v2186_v26 = vld.sshfl [vmem:[#allocation4 + $0x4] sm:$0x1 pattern:$0x76325410]  ;;  %v1377_v19 = vlaneseq }
 0x2ff   :  { %1129 = vrot.lane.b32.xlu0 %v2183_v18, %s2766_s19  ;;  %v1234_v20 = vld [vmem:[#allocation4 + $0x8] sm:$0x1]  ;;  %v2185_v30 = vld.sshfl [vmem:[#allocation4 + $0x3] sm:$0x1 pattern:$0x76325410]  ;;  %v1375_v18 = vunpack.c.l.s4 %v2772_v17 }
 0x300   :  { %1235 = vst.msk [vmem:[#allocation5 + $0xa] sm:$0x1] %vm1118_vm7, %v1234_v20  ;;  %v2184_v32 = vld.sshfl [vmem:[#allocation4 + $0x2] sm:$0x1 pattern:$0x76325410] }
 0x301   :  { %v2196_v33 = vld.sshfl [vmem:[#allocation4 + $0x16] sm:$0x1 pattern:$0x76325410]  ;;  %vm1217_vm7 = vcmask 387074   ;;  %v1376_v24 = vunpack.c.0.s8 %v1375_v18  ;;  %v1378_v25 = vshrl.u32 %v1377_v19, 7 }
 0x302   :  { %1277 = vrot.lane.b32.xlu1 %v2192_v23, %s2767_s0  ;;  %v2188_v37 = vld.sshfl [vmem:[#allocation4 + $0x6] sm:$0x1 pattern:$0x76325410]  ;;  %vm1218_vm9 = vmor %vm1217_vm7, %vm1216_vm6 }
 0x303   :  { %1179 = vrot.lane.b32.xlu0 %v2186_v26, %s2760_s18  ;;  %v2195_v42 = vld.sshfl [vmem:[#allocation4 + $0x15] sm:$0x1 pattern:$0x76325410]  ;;  %v1379_v31 = vsub.s32 %v1376_v24, %v1378_v25  ;;  %v2199_v24 = vld [vmem:[%s3197_s8] ss:$0 sm:$0xff] }
 0x304   :  { %v2187_v44 = vld.sshfl [vmem:[#allocation4 + $0x5] sm:$0x1 pattern:$0x76325410] }
 0x305   :  { %v2198_v47 = vld.sshfl [vmem:[#allocation4 + $0x19] sm:$0x1 pattern:$0x76325410] }
 0x306   :  { %1161 = vrot.lane.b32.xlu1 %v2185_v30, %s2765_s15  ;;  %s2768_s15 = smov 96   ;;  %v2190_v50 = vld.sshfl [vmem:[#allocation4 + $0x9] sm:$0x1 pattern:$0x76325410] }
 0x307   :  { %1147 = vrot.lane.b32.xlu0 %v2184_v32, %s2767_s0  ;;  %v2197_v51 = vld.sshfl [vmem:[#allocation4 + $0x17] sm:$0x1 pattern:$0x76325410] }
 0x308   :  { %v2189_v52 = vld.sshfl [vmem:[#allocation4 + $0x7] sm:$0x1 pattern:$0x76325410] }
 0x30a   :  { %1333 = vrot.lane.b32.xlu1 %v2196_v33, %s2768_s15 }
 0x30b   :  { %1211 = vrot.lane.b32.xlu0 %v2188_v37, %s2768_s15  ;;  %s2774_s15 = smov [#allocation12]  }
 0x30c   :  { %s2077_s25 = sshll.u32 %s2774_s15, 4  ;;  %s2078_s25 = int_to_ptr.vmem [resolvable:$true] %s2077_s25 }
 0x30d   :  { %s2732_s8 = scalar_lea.vmem %s2078_s25, 32  ;;  %p2737_p2 = scmp.lt.s32.totalorder %s2078_s25, %s2078_s25 }
 0x30e   :  { %1320 = vrot.lane.b32.xlu1 %v2195_v42, %s2769_s9  ;;  %p2733_p1 = scmp.ne.s32.totalorder %s2078_s25, %s2732_s8  ;;  %p2738_p3 = scmp.lt.s32.totalorder %s2732_s8, %s2732_s8 }
 0x30f   :  { %1197 = vrot.lane.b32.xlu0 %v2187_v44, %s2769_s9  ;;  %v2655_v44 = vld [vmem:[%s3196_s7 + $0x170] sm:$0xff]  }
 0x310   :  { %p2739_p4 = por %p2738_p3, %p2737_p2 }
 0x312   :  { %1363 = vrot.lane.b32.xlu1 %v2198_v47, %s2766_s19  ;;  %p2740_p5 = pnand %p2739_p4, %p2733_p1 }
 0x313   :  { %1245 = vrot.lane.b32.xlu0 %v2190_v50, %s2766_s19 }
 0x316   :  { %1348 = vrot.lane.b32.xlu1 %v2197_v51, %s2770_s17  ;;  %v2657_v51 = vld [vmem:[%s3196_s7 + $0x130] sm:$0xff]  }
 0x317   :  { %1229 = vrot.lane.b32.xlu0 %v2189_v52, %s2770_s17 }
 0x36c   :  { %v1291_v54 = vpop.permute.xlu1 %1290 }
 0x36d   :  { %v1263_v55 = vpop.permute.xlu0 %1262  ;;  %v1292_v60 = vrot.slane %v1291_v54, 6 }
 0x36e   :  { %v1264_v57 = vrot.slane %v1263_v55, 6 }
 0x36f   :  { %v1293_v4 = vsel %vm379_vm1, %v1292_v60, %v1291_v54  ;;  %v2659_v54 = vld [vmem:[%s3196_s7 + $0x168] sm:$0xff]  }
 0x370   :  { %v1265_v58 = vsel %vm1111_vm5, %v1264_v57, %v1263_v55  ;;  %v1306_v59 = vpop.permute.xlu1 %1305  ;;  %v2660_v55 = vld [vmem:[%s3196_s7 + $0x180] sm:$0xff]  }
 0x371   :  { %1267 = vst.msk [vmem:[#allocation5 + $0x1] sm:$0x5] %vm3081_vm10, %v1265_v58  ;;  %v1130_v61 = vpop.permute.xlu0 %1129  ;;  %v1307_v62 = vrot.slane %v1306_v59, 6  ;;  %v2661_v58 = vld [vmem:[%s3196_s7 + $0x128] sm:$0xff]  }
 0x372   :  { %v1131_v63 = vrot.slane %v1130_v61, 6 }
 0x373   :  { %v1308_v6 = vsel %vm131_vm0, %v1307_v62, %v1306_v59  ;;  %v2662_v59 = vld [vmem:[%s3196_s7 + $0x160] sm:$0xff]   ;;  %v2664_v62 = vld [vmem:[%s3196_s7 + $0x158] sm:$0xff]  }
 0x374   :  { %v1132_v1 = vsel %vm1111_vm5, %v1131_v63, %v1130_v61  ;;  %v1278_v2 = vpop.permute.xlu1 %1277  ;;  %v2663_v61 = vld [vmem:[%s3196_s7 + $0x120] sm:$0xff]   ;;  %v2665_v63 = vld [vmem:[%s3196_s7 + $0x118] sm:$0xff]  }
 0x375   :  { %1137 = vst.msk [vmem:[#allocation5] sm:$0x5] %vm3081_vm10, %v1132_v1  ;;  %v1180_v5 = vpop.permute.xlu0 %1179  ;;  %v2667_v1 = vld [vmem:[%s3196_s7 + $0x110] sm:$0xff]  }
 0x376   :  { %1280 = vst.msk [vmem:[#allocation5 + $0x3] sm:$0x1] %vm1150_vm15, %v1278_v2  ;;  %v1181_v7 = vrot.slane %v1180_v5, 6  ;;  %v2668_v2 = vld [vmem:[%s3196_s7 + $0x148] sm:$0xff]  }
 0x377   :  { %1295 = vst.msk [vmem:[#allocation5 + $0x3] sm:$0x5] %vm3088_vm2, %v1293_v4  ;;  %v2670_v4 = vld [vmem:[%s3196_s7 + $0x140] sm:$0xff]  }
 0x378   :  { %1310 = vst.msk [vmem:[#allocation5 + $0x5] sm:$0x5] %vm3093_vm4, %v1308_v6  ;;  %v1162_v8 = vpop.permute.xlu1 %1161  ;;  %v1182_v12 = vsel %vm131_vm0, %v1181_v7, %v1180_v5  ;;  %vm1232_vm0 = vcmask 1040768   ;;  %v2671_v5 = vld [vmem:[%s3196_s7 + $0x100] sm:$0xff]   ;;  %v1995_v7 = vld [vmem:[#allocation11 + $0x18] sm:$0xff] }
 0x379   :  { %v1163_v9 = vrot.slane %v1162_v8, 6  ;;  %v1148_v10 = vpop.permute.xlu0 %1147 }
 0x37a   :  { %1151 = vst.msk [vmem:[#allocation5 + $0x2] sm:$0x1] %vm1150_vm15, %v1148_v10  ;;  %v1992_v10 = vld [vmem:[#allocation11] sm:$0xff] }
 0x37b   :  { %v1164_v11 = vsel %vm379_vm1, %v1163_v9, %v1162_v8  ;;  %vm2773_vm1 = vmmov 0   ;;  %v1994_v8 = vld [vmem:[#allocation11 + $0x10] sm:$0xff]  ;;  %v1993_v9 = vld [vmem:[#allocation11 + $0x8] sm:$0xff] }
 0x37c   :  { %1169 = vst.msk [vmem:[#allocation5 + $0x2] sm:$0x5] %vm3088_vm2, %v1164_v11  ;;  %v1334_v13 = vpop.permute.xlu1 %1333 }
 0x37d   :  { %v1335_v14 = vrot.slane %v1334_v13, 6  ;;  %v1212_v15 = vpop.permute.xlu0 %1211  ;;  %1187 = vst.msk [vmem:[#allocation5 + $0x4] sm:$0x5] %vm3093_vm4, %v1182_v12 }
 0x37e   :  { %v1213_v16 = vrot.slane %v1212_v15, 6 }
 0x37f   :  { %v1336_v21 = vsel %vm757_vm3, %v1335_v14, %v1334_v13 }
 0x380   :  { %v1321_v20 = vpop.permute.xlu1 %1320  ;;  %v1214_v23 = vsel %vm757_vm3, %v1213_v16, %v1212_v15  ;;  %vm1827_vm3 = vcmask 261120  }
 0x381   :  { %1323 = vst.msk [vmem:[#allocation5 + $0x7] sm:$0x1] %vm1200_vm8, %v1321_v20  ;;  %v1198_v22 = vpop.permute.xlu0 %1197 }
 0x382   :  { %1201 = vst.msk [vmem:[#allocation5 + $0x6] sm:$0x1] %vm1200_vm8, %v1198_v22 }
 0x383   :  { %1338 = vst.msk [vmem:[#allocation5 + $0x7] sm:$0x5] %vm1218_vm9, %v1336_v21  ;;  %1219 = vst.msk [vmem:[#allocation5 + $0x6] sm:$0x5] %vm1218_vm9, %v1214_v23 }
 0x384   :  { %v1364_v26 = vpop.permute.xlu1 %1363 }
 0x385   :  { %v1365_v27 = vrot.slane %v1364_v26, 6  ;;  %v1246_v28 = vpop.permute.xlu0 %1245 }
 0x386   :  { %v1247_v29 = vrot.slane %v1246_v28, 6 }
 0x387   :  { %v1366_v30 = vsel %vm1111_vm5, %v1365_v27, %v1364_v26 }
 0x388   :  { %1368 = vst.msk [vmem:[#allocation5 + $0xb] sm:$0x5] %vm3081_vm10, %v1366_v30  ;;  %v1248_v32 = vsel %vm1111_vm5, %v1247_v29, %v1246_v28  ;;  %v1349_v33 = vpop.permute.xlu1 %1348  ;;  %vm2069_vm5 = vcmask 17408  }
 0x389   :  { %1250 = vst.msk [vmem:[#allocation5 + $0xa] sm:$0x5] %vm3081_vm10, %v1248_v32  ;;  %v1230_v34 = vpop.permute.xlu0 %1229 }
 0x38a   :  { %1351 = vst.msk [vmem:[#allocation5 + $0x9] sm:$0x1] %vm1232_vm0, %v1349_v33  ;;  %1233 = vst.msk [vmem:[#allocation5 + $0x8] sm:$0x1] %vm1232_vm0, %v1230_v34  ;;  %v1369_v35 = vld [vmem:[#allocation5] sm:$0xff] }
 0x38b   :  { %v1380_v36 = vrot.slane %v1369_v35, %v1379_v31  ;;  %v1373_v37 = vcombine.high %v1369_v35, %v1369_v35 }
 0x38d   :  { %v1388_v38 = vcombine.high %v1380_v36, %v1380_v36  ;;  %v1387_v39 = vrot.slane %v1373_v37, %v1379_v31  ;;  %v1413_v43 = vpack.c.bf16 %v1380_v36, %v1380_v36 }
 0x38f   :  { %v1414_v40 = vpack.c.bf16 %v1388_v38, %v1388_v38  ;;  %v1389_v42 = vcombine.high %v1387_v39, %v1387_v39  ;;  %v1415_v48 = vpack.c.bf16 %v1387_v39, %v1387_v39 }
 0x391   :  { %1863 = vmatprep.mubr.bf16.mxu1 %v1414_v40  ;;  %v1416_v45 = vpack.c.bf16 %v1389_v42, %v1389_v42  ;;  %v1370_v47 = vld [vmem:[#allocation5 + $0x8] sm:$0x3f] }
 0x392   :  { %1864 = vmatmul.mubr.bf16.vlgmr.msra.gmra.mxu1 %v1413_v43  ;;  %v1390_v49 = vcombine.high %v1370_v47, %v1370_v47  ;;  %v1397_v50 = vrot.slane %v1370_v47, %v1379_v31 }
 0x393   :  { %2366 = vmatpush3.bf16.msra.mxu1 %v2653_v41  ;;  %1903 = vmatprep.mubr.bf16.mxu0 %v1416_v45 }
 0x394   :  { %1904 = vmatmul.mubr.bf16.vlgmr.msra.gmra.mxu0 %v1415_v48  ;;  %2367 = vmatprep.subr.bf16.mxu1 %v2655_v44  ;;  %v1405_v52 = vcombine.high %v1397_v50, %v1397_v50  ;;  %v1404_v56 = vrot.slane %v1390_v49, %v1379_v31  ;;  %v1417_v6 = vpack.c.bf16 %v1397_v50, %v1397_v50 }
 0x395   :  { %2534 = vmatpush3.bf16.msra.mxu0 %v2656_v46  ;;  %2537 = vmatprep.mubr.msk.bf16.mxu0 %vm2773_vm1, %v2771_v53 }
 0x396   :  { %v1418_v57 = vpack.c.bf16 %v1405_v52, %v1405_v52  ;;  %2535 = vmatprep.subr.bf16.mxu0 %v2771_v53  ;;  %v1419_v60 = vpack.c.bf16 %v1404_v56, %v1404_v56 }
 0x397   :  { %2368 = vmatpush3.bf16.msra.mxu1 %v2657_v51 }
 0x398   :  { %1943 = vmatprep.mubr.bf16.mxu1 %v1418_v57  ;;  %2369 = vmatprep.subr.bf16.mxu1 %v2659_v54 }
 0x399   :  { %2536 = vmatpush3.bf16.msra.mxu0 %v2660_v55 }
 0x39a   :  { %2541 = vmatprep.subr.mxu0 %v2771_v53 }
 0x39b   :  { %2370 = vmatpush3.bf16.msra.mxu1 %v2661_v58 }
 0x39c   :  { %2538 = vmatmul.mubr.msk.bf16.vlgmr.msra.gmra.mxu0 %vm1827_vm3, %v1419_v60  ;;  %2371 = vmatprep.subr.bf16.mxu1 %v2662_v59 }
 0x39d   :  { %2549 = vmatprep.mubr.msk.f32.mxu0 %vm2773_vm1, %v2771_v53  ;;  %2542 = vmatpush3.msra.mxu0 %v1995_v7 }
 0x39e   :  { %2543 = vmatprep.subr.mxu0 %v2771_v53 }
 0x39f   :  { %2372 = vmatpush3.bf16.msra.mxu1 %v2663_v61  ;;  %2544 = vmatpush3.msra.mxu0 %v1994_v8 }
 0x3a0   :  { %2373 = vmatprep.subr.bf16.mxu1 %v2664_v62  ;;  %2545 = vmatprep.subr.mxu0 %v2771_v53 }
 0x3a1   :  { %2546 = vmatpush3.msra.mxu0 %v1993_v9 }
 0x3a2   :  { %2547 = vmatprep.subr.mxu0 %v2771_v53 }
 0x3a3   :  { %2374 = vmatpush3.bf16.msra.mxu1 %v2665_v63  ;;  %2548 = vmatpush3.msra.mxu0 %v1992_v10 }
 0x3a4   :  { %2375 = vmatprep.subr.bf16.mxu1 %v2666_v0 }
 0x3a7   :  { %2376 = vmatpush3.bf16.msra.mxu1 %v2667_v1 }
 0x3a8   :  { %2377 = vmatprep.subr.bf16.mxu1 %v2668_v2 }
 0x3ab   :  { %2378 = vmatpush3.bf16.msra.mxu1 %v2669_v3 }
 0x3ac   :  { %2379 = vmatprep.subr.bf16.mxu1 %v2670_v4 }
 0x3af   :  { %2380 = vmatpush3.bf16.msra.mxu1 %v2671_v5 }
 0x3b2   :  { %1944 = vmatmul.mubr.bf16.vlgmr.msra.gmra.mxu1 %v1417_v6 }
 0x452   :  { %v2337_v11 = vpop.f32.mrf.mxu1 }
 0x454   :  { %v2338_v12 = vpop.f32.mrf.mxu1  ;;  %v2359_v13 = vpop.f32.mrf.mxu0 }
 0x455   :  { %v2339_v23 = vadd.f32 %v2338_v12, %v2337_v11 }
 0x456   :  { %v2340_v14 = vpop.f32.mrf.mxu1  ;;  %v2360_v15 = vpop.f32.mrf.mxu0 }
 0x457   :  { %v1866_v25 = vadd.f32 %v2339_v23, %v2199_v24  ;;  %v2361_v53 = vadd.f32 %v2360_v15, %v2359_v13 }
 0x458   :  { %v2341_v16 = vpop.f32.mrf.mxu1  ;;  %v2362_v17 = vpop.f32.mrf.mxu0 }
 0x459   :  { %v1906_v28 = vadd.f32 %v2361_v53, %v1866_v25 }
 0x45a   :  { %v2363_v18 = vpop.f32.mrf.mxu0 }
 0x45c   :  { %v1985_v19 = vpop.f32.mrf.mxu0 }
 0x45e   :  { %v2539_v20 = vpop.f32.mrf.mxu0 }
 0x460   :  { %v1988_v21 = vpop.f32.mrf.mxu0 }
 0x462   :  { %v2540_v22 = vpop.f32.mrf.mxu0 }
 0x472   :  { %v2381_v26 = vpop.f32.mrf.mxu1 }
 0x474   :  { %v2382_v27 = vpop.f32.mrf.mxu1 }
 0x475   :  { %v2383_v29 = vadd.f32 %v2382_v27, %v2381_v26 }
 0x476   :  { %v2384_v30 = vpop.f32.mrf.mxu1 }
 0x477   :  { %v1946_v31 = vadd.f32 %v2383_v29, %v1906_v28 }
 0x478   :  { %v2385_v32 = vpop.f32.mrf.mxu1 }
 0x479   :  { %v1986_v33 = vadd.f32 %v1985_v19, %v1946_v31 }
 0x47b   :  { %v1991_v34 = vmax.f32 %v1986_v33, 0.0 }
 0x47d   :  { %2550 = vmatmul.mubr.msk.f32.vlgmr.msra.gmra.mxu0 %vm1827_vm3, %v1991_v34 }
 0x53d   :  { %v2065_v35 = vpop.f32.mrf.mxu0 }
 0x53e   :  { %2070 = vst.msk [vmem:[#allocation12] sm:$0x3] %vm2069_vm5, %v2065_v35 }
 0x53f   :  { %v2551_v36 = vpop.f32.mrf.mxu0 }
 0x540   :  { %2743 = shalt.err (!%p2740_p5)
}
 0x541   :  { %2080 = dma.vmem_to_hbm [thread:$0]  %s2078_s25, 32, %s3199_s10, [#allocation8]  }
 0x542   :  { %2756 = dma.done.wait [#allocation8], 32  }
 0x543   :  { %2757 = vsyncadd [#allocation8], 4294967264 }
 0x544   :  { %2084 = vsyncpa [#allocation7], 1 }
 0x545   :  { %2085 = vsyncpa [#allocation10], 1 }
 0x546   :  { %2086 = vsyncpa [#allocation8], 1 }

</bundles_post_ra>
